<compile_context>
chip_gen: v6e
topology: v6e:2x2x1
jax: 0.10.0
libtpu: 0.0.40
codegen_flags: <defaults>
</compile_context>

<pallas_src>
import math
from functools import partial

import jax
import jax.numpy as jnp
from jax import lax
from jax.experimental import pallas as pl
from jax.experimental.pallas import tpu as pltpu


def attention_kernel(mask_ref, xfull_ref, xq_ref,
                     wq_ref, wkv_ref, wo_ref, smalls_ref,
                     out_ref,
                     k_scr, v_scr, ctx_scr,
                     *, num_heads, head_dim, eps, bf16_exp):
    H = num_heads * head_dim
    S = k_scr.shape[0]
    q_tile = ctx_scr.shape[0]
    qi = pl.program_id(1)

    # packed small params: rows = (bq * 1/sqrt(dh), bk, bv, bo, gamma, beta)
    bq_s = smalls_ref[0:1, :]
    bk = smalls_ref[1:2, :]
    bv = smalls_ref[2:3, :]
    bo = smalls_ref[3:4, :]
    gamma = smalls_ref[4:5, :]
    beta = smalls_ref[5:6, :]

    # ---- K/V projection: once per batch element; scratch persists over q-tiles ----
    @pl.when(qi == 0)
    def _():
        x_full = xfull_ref[0]                                      # (S, H) bf16
        kv = jnp.dot(x_full, wkv_ref[...],
                     preferred_element_type=jnp.float32)           # (S, 2H) f32 acc
        k_scr[...] = (kv[:, 0:H] + bk).astype(jnp.bfloat16)
        v_scr[...] = (kv[:, H:2 * H] + bv).astype(jnp.bfloat16)

    # ---- per-query-tile Q projection (1/sqrt(dh) already folded into Wq/bq) ----
    x_res = xq_ref[0]                                              # (TQ, H) f32 residual
    q_all = (jnp.dot(x_res.astype(jnp.bfloat16), wq_ref[...],
                     preferred_element_type=jnp.float32) + bq_s
             ).astype(jnp.bfloat16)                                # (TQ, H) bf16, pre-scaled

    k_all = k_scr[...]                                             # (S, H) bf16
    v_all = v_scr[...]                                             # (S, H) bf16
    # hoist the mask broadcast out of the head unroll (JAX does not CSE it)
    mask_b = jnp.broadcast_to(mask_ref[0], (q_tile, S))            # (TQ, S) f32

    # Static unroll over heads; each head writes its context directly into a
    # lane slice of the (TQ, H) bf16 scratch -- no concatenate copy.
    for h in range(num_heads):
        sl = slice(h * head_dim, (h + 1) * head_dim)
        qh = q_all[:, sl]                                          # (TQ, dh) bf16
        kh = k_all[:, sl]                                          # (S,  dh) bf16
        vh = v_all[:, sl]                                          # (S,  dh) bf16

        # q @ k^T without transposing K (contract the head dim of both operands).
        # TODO(synk): verify via pl.lower_as_mlir that no per-tile XLU transpose is
        #             emitted; otherwise store K transposed (H, S) at projection time.
        s = lax.dot_general(qh, kh, (((1,), (1,)), ((), ())),
                            preferred_element_type=jnp.float32)    # (TQ, S) f32
        s = s + mask_b

        m = jnp.max(s, axis=-1, keepdims=True)
        if bf16_exp:
            # v6e/v7x: bf16 exp packs 2/lane on the EUP; max/row-sum stay f32.
            e = jnp.exp((s - m).astype(jnp.bfloat16))
            denom = jnp.sum(e.astype(jnp.float32), axis=-1, keepdims=True)
            p = e * pl.reciprocal(denom, approx=True).astype(jnp.bfloat16)
        else:
            e = jnp.exp(s - m)
            denom = jnp.sum(e, axis=-1, keepdims=True)
            p = (e * pl.reciprocal(denom, approx=True)).astype(jnp.bfloat16)

        ctx_scr[:, sl] = jnp.dot(p, vh,
                                 preferred_element_type=jnp.float32
                                 ).astype(jnp.bfloat16)            # (TQ, dh)

    # TODO(synk): if the MXU becomes the binding unit (after the bf16-exp change),
    #             batch the per-head score / P@V matmuls to improve MXU fill at
    #             small head_dim.

    # ---- output projection + residual + LayerNorm ----
    proj = jnp.dot(ctx_scr[...], wo_ref[...],
                   preferred_element_type=jnp.float32) + bo        # (TQ, H) f32
    hs = proj + x_res

    u = jnp.mean(hs, axis=-1, keepdims=True)
    d = hs - u
    var = jnp.mean(d * d, axis=-1, keepdims=True)
    normed = d * lax.rsqrt(var + eps)
    out_ref[0] = (gamma * normed + beta).astype(out_ref.dtype)


def attention_forward(x, attention_mask, params, *, num_heads, eps=1e-12, q_tile=None):
    """x: [B, S, H] f32; attention_mask: [B, 1, 1, S] additive mask."""
    B, S, H = x.shape
    assert H % num_heads == 0
    head_dim = H // num_heads

    if q_tile is None:
        q_tile = S
        for cand in (512, 256, 128, 64, 32, 16, 8):
            if cand <= S and S % cand == 0:
                q_tile = cand
                break
    assert S % q_tile == 0, "S must be divisible by the query tile"
    n_q = S // q_tile

    mask3d = attention_mask.reshape(B, 1, S).astype(jnp.float32)
    x_bf16 = x.astype(jnp.bfloat16)   # full-seq copy used only for the K/V projection

    wq, bq, wk, bk, wv, bv, wo, bo, gamma, beta = params
    inv_sqrt_d = 1.0 / math.sqrt(head_dim)
    # nn.Linear stores W[out, in]; pre-transpose once (wrapper-side XLA).
    wq_t = (wq.T * inv_sqrt_d).astype(jnp.bfloat16)                     # (H, H), scale folded in
    wkv_t = jnp.concatenate([wk.T, wv.T], axis=1).astype(jnp.bfloat16)  # (H, 2H)
    wo_t = wo.T.astype(jnp.bfloat16)                                    # (H, H)
    smalls = jnp.stack([bq * inv_sqrt_d, bk, bv, bo, gamma, beta],
                       axis=0).astype(jnp.float32)                      # (6, H)

    # bf16 EUP exp only on v6e/v7x (v5e has no bf16 EUP).
    try:
        device_kind = jax.devices()[0].device_kind.lower()
    except Exception:  # pragma: no cover
        device_kind = ""
    bf16_exp = ("v6" in device_kind) or ("v7" in device_kind)

    # Generation-aware VMEM budget instead of a flat 48 MiB.
    try:
        vmem_cap = int(pltpu.get_tpu_info().vmem_capacity_bytes)
    except Exception:  # pragma: no cover
        vmem_cap = 64 << 20
    vmem_limit = int(max(32 << 20, min(vmem_cap - (8 << 20), 112 << 20)))

    kernel = partial(attention_kernel, num_heads=num_heads, head_dim=head_dim,
                     eps=eps, bf16_exp=bf16_exp)

    def build(single_buffer_consts):
        def const_spec(shape):
            # Constant-index weight blocks: a second pipeline buffer is pure waste.
            if single_buffer_consts:
                return pl.BlockSpec(shape, lambda b, qi: (0, 0),
                                    pipeline_mode=pl.Buffered(1))
            return pl.BlockSpec(shape, lambda b, qi: (0, 0))

        return pl.pallas_call(
            kernel,
            out_shape=jax.ShapeDtypeStruct((B, S, H), jnp.float32),
            grid_spec=pltpu.PrefetchScalarGridSpec(
                num_scalar_prefetch=0,
                grid=(B, n_q),
                in_specs=[
                    pl.BlockSpec((1, 1, S), lambda b, qi: (b, 0, 0)),        # additive mask
                    pl.BlockSpec((1, S, H), lambda b, qi: (b, 0, 0)),        # x full seq (bf16, K/V proj)
                    pl.BlockSpec((1, q_tile, H), lambda b, qi: (b, qi, 0)),  # x query tile (f32, Q + residual)
                    const_spec((H, H)),        # Wq^T * 1/sqrt(dh)  (bf16)
                    const_spec((H, 2 * H)),    # [Wk^T | Wv^T]      (bf16)
                    const_spec((H, H)),        # Wo^T               (bf16)
                    const_spec((6, H)),        # packed bq*s, bk, bv, bo, gamma, beta (f32)
                ],
                out_specs=pl.BlockSpec((1, q_tile, H), lambda b, qi: (b, qi, 0)),
                scratch_shapes=[
                    pltpu.VMEM((S, H), jnp.bfloat16),        # K, persists over q-tiles
                    pltpu.VMEM((S, H), jnp.bfloat16),        # V
                    pltpu.VMEM((q_tile, H), jnp.bfloat16),   # per-head context assembly
                ],
            ),
            compiler_params=pltpu.CompilerParams(
                dimension_semantics=("parallel", "arbitrary"),
                vmem_limit_bytes=vmem_limit,
            ),
        )

    args = (mask3d, x_bf16, x, wq_t, wkv_t, wo_t, smalls)
    try:
        return build(True)(*args)
    except Exception:
        # TODO(synk): pipeline_mode=pl.Buffered(1) unsupported on this JAX version;
        # fall back to default double-buffered constant blocks.
        return build(False)(*args)


def reference_forward(x, attention_mask, params, *, num_heads, eps=1e-12):
    """Plain-JAX mirror of the PyTorch module (eval mode) for verification."""
    wq, bq, wk, bk, wv, bv, wo, bo, gamma, beta = params
    B, S, H = x.shape
    dh = H // num_heads

    def split(t):  # (B,S,H) -> (B,nH,S,dh)
        return t.reshape(B, S, num_heads, dh).transpose(0, 2, 1, 3)

    q = split(x @ wq.T + bq)
    k = split(x @ wk.T + bk)
    v = split(x @ wv.T + bv)
    scores = jnp.einsum('bhqd,bhkd->bhqk', q, k) / math.sqrt(dh)
    scores = scores + attention_mask
    probs = jax.nn.softmax(scores, axis=-1)
    ctx = jnp.einsum('bhqk,bhkd->bhqd', probs, v)
    ctx = ctx.transpose(0, 2, 1, 3).reshape(B, S, H)
    hs = ctx @ wo.T + bo + x
    u = hs.mean(-1, keepdims=True)
    s = ((hs - u) ** 2).mean(-1, keepdims=True)
    return gamma * ((hs - u) / jnp.sqrt(s + eps)) + beta


if __name__ == "__main__":
    B, S, H, num_heads = 2, 16, 32, 4

    key = jax.random.PRNGKey(0)
    ks = jax.random.split(key, 12)

    scale = 0.05
    wq = scale * jax.random.normal(ks[0], (H, H), jnp.float32)
    bq = scale * jax.random.normal(ks[1], (H,), jnp.float32)
    wk = scale * jax.random.normal(ks[2], (H, H), jnp.float32)
    bk = scale * jax.random.normal(ks[3], (H,), jnp.float32)
    wv = scale * jax.random.normal(ks[4], (H, H), jnp.float32)
    bv = scale * jax.random.normal(ks[5], (H,), jnp.float32)
    wo = scale * jax.random.normal(ks[6], (H, H), jnp.float32)
    bo = scale * jax.random.normal(ks[7], (H,), jnp.float32)
    gamma = jnp.ones((H,), jnp.float32)
    beta = jnp.zeros((H,), jnp.float32)
    params = (wq, bq, wk, bk, wv, bv, wo, bo, gamma, beta)

    x = jax.random.normal(ks[8], (B, S, H), jnp.float32)
    # additive BERT mask: 0 for visible, -10000 for masked positions
    visible = (jax.random.uniform(ks[9], (B, S)) > 0.2).astype(jnp.float32)
    attention_mask = ((1.0 - visible) * -10000.0).reshape(B, 1, 1, S)

    out = attention_forward(x, attention_mask, params, num_heads=num_heads, q_tile=8)
    out = jax.block_until_ready(out)

    ref = reference_forward(x, attention_mask, params, num_heads=num_heads)
    assert out.shape == (B, S, H)
    max_err = float(jnp.max(jnp.abs(out - ref)))
    # bf16 matmul inputs + bf16 exp (v6e/v7x) + approx reciprocal -> loose tolerance
    assert jnp.allclose(out, ref, atol=2e-2, rtol=2e-2), f"mismatch vs reference (max err {max_err})"

    print("KERNEL_OK")
</pallas_src>

<mosaic_0001>
module attributes {stable_mosaic.version = 11 : i64} {
  func.func @attention_kernel(%arg0: i32, %arg1: i32, %arg2: memref<1x1x16xf32, #tpu.memory_space<vmem>>, %arg3: memref<1x16x32xbf16, #tpu.memory_space<vmem>>, %arg4: memref<1x8x32xf32, #tpu.memory_space<vmem>>, %arg5: memref<32x32xbf16, #tpu.memory_space<vmem>>, %arg6: memref<32x64xbf16, #tpu.memory_space<vmem>>, %arg7: memref<32x32xbf16, #tpu.memory_space<vmem>>, %arg8: memref<6x32xf32, #tpu.memory_space<vmem>>, %arg9: memref<1x8x32xf32, #tpu.memory_space<vmem>>, %arg10: memref<16x32xbf16, #tpu.memory_space<vmem>>, %arg11: memref<16x32xbf16, #tpu.memory_space<vmem>>, %arg12: memref<8x32xbf16, #tpu.memory_space<vmem>>) attributes {dimension_semantics = [#tpu.dimension_semantics<parallel>, #tpu.dimension_semantics<arbitrary>], iteration_bounds = array<i64: 2, 2>, scalar_prefetch = 0 : i64, scratch_operands = 3 : i64, tpu.core_type = #tpu.core_type<tc>, window_params = [{transform_indices = @transform_0, window_bounds = array<i64: 1, 1, 16>}, {transform_indices = @transform_1, window_bounds = array<i64: 1, 16, 32>}, {transform_indices = @transform_2, window_bounds = array<i64: 1, 8, 32>}, {pipeline_mode = #tpu.pipeline_mode<synchronous>, transform_indices = @transform_3, window_bounds = array<i64: 32, 32>}, {pipeline_mode = #tpu.pipeline_mode<synchronous>, transform_indices = @transform_4, window_bounds = array<i64: 32, 64>}, {pipeline_mode = #tpu.pipeline_mode<synchronous>, transform_indices = @transform_5, window_bounds = array<i64: 32, 32>}, {pipeline_mode = #tpu.pipeline_mode<synchronous>, transform_indices = @transform_6, window_bounds = array<i64: 6, 32>}, {transform_indices = @transform_7, window_bounds = array<i64: 1, 8, 32>}]} {
    %c0 = arith.constant 0 : index
    %c0_0 = arith.constant 0 : index
    %0 = vector.load %arg8[%c0, %c0_0] : memref<6x32xf32, #tpu.memory_space<vmem>>, vector<1x32xf32>
    %c1 = arith.constant 1 : index
    %c0_1 = arith.constant 0 : index
    %1 = vector.load %arg8[%c1, %c0_1] : memref<6x32xf32, #tpu.memory_space<vmem>>, vector<1x32xf32>
    %c2 = arith.constant 2 : index
    %c0_2 = arith.constant 0 : index
    %2 = vector.load %arg8[%c2, %c0_2] : memref<6x32xf32, #tpu.memory_space<vmem>>, vector<1x32xf32>
    %c3 = arith.constant 3 : index
    %c0_3 = arith.constant 0 : index
    %3 = vector.load %arg8[%c3, %c0_3] : memref<6x32xf32, #tpu.memory_space<vmem>>, vector<1x32xf32>
    %c4 = arith.constant 4 : index
    %c0_4 = arith.constant 0 : index
    %4 = vector.load %arg8[%c4, %c0_4] : memref<6x32xf32, #tpu.memory_space<vmem>>, vector<1x32xf32>
    %c5 = arith.constant 5 : index
    %c0_5 = arith.constant 0 : index
    %5 = vector.load %arg8[%c5, %c0_5] : memref<6x32xf32, #tpu.memory_space<vmem>>, vector<1x32xf32>
    %c0_i32 = arith.constant 0 : i32
    %6 = arith.cmpi eq, %arg1, %c0_i32 : i32
    %7 = arith.extui %6 : i1 to i32
    %c0_i32_6 = arith.constant 0 : i32
    %8 = arith.cmpi ne, %7, %c0_i32_6 : i32
    scf.if %8 {
      %c0_53 = arith.constant 0 : index
      %c0_54 = arith.constant 0 : index
      %c0_55 = arith.constant 0 : index
      %128 = vector.load %arg3[%c0_53, %c0_54, %c0_55] : memref<1x16x32xbf16, #tpu.memory_space<vmem>>, vector<1x16x32xbf16>
      %129 = vector.shape_cast %128 : vector<1x16x32xbf16> to vector<16x32xbf16>
      %c0_56 = arith.constant 0 : index
      %c0_57 = arith.constant 0 : index
      %130 = vector.load %arg6[%c0_56, %c0_57] : memref<32x64xbf16, #tpu.memory_space<vmem>>, vector<32x64xbf16>
      %cst_58 = arith.constant dense<0.000000e+00> : vector<16x64xf32>
      %131 = tpu.matmul %129, %130, %cst_58 {dimension_numbers = #tpu.dot_dimension_numbers<[1], [0], [0], [1], [0, 0, 1, 1], [], []>} : vector<16x32xbf16>, vector<32x64xbf16>, vector<16x64xf32> -> vector<16x64xf32>
      %132 = vector.extract_strided_slice %131 {offsets = [0, 0], sizes = [16, 32], strides = [1, 1]} : vector<16x64xf32> to vector<16x32xf32>
      %133 = vector.broadcast %1 : vector<1x32xf32> to vector<16x32xf32>
      %134 = arith.addf %132, %133 : vector<16x32xf32>
      %135 = arith.truncf %134 : vector<16x32xf32> to vector<16x32xbf16>
      %c0_59 = arith.constant 0 : index
      %c0_60 = arith.constant 0 : index
      %136 = vector.load %arg10[%c0_59, %c0_60] : memref<16x32xbf16, #tpu.memory_space<vmem>>, vector<16x32xbf16>
      tpu.vector_store %arg10[%c0_59, %c0_60], %135 {strides = array<i32>} : memref<16x32xbf16, #tpu.memory_space<vmem>>, vector<16x32xbf16>,
      %137 = vector.extract_strided_slice %131 {offsets = [0, 32], sizes = [16, 32], strides = [1, 1]} : vector<16x64xf32> to vector<16x32xf32>
      %138 = vector.broadcast %2 : vector<1x32xf32> to vector<16x32xf32>
      %139 = arith.addf %137, %138 : vector<16x32xf32>
      %140 = arith.truncf %139 : vector<16x32xf32> to vector<16x32xbf16>
      %c0_61 = arith.constant 0 : index
      %c0_62 = arith.constant 0 : index
      %141 = vector.load %arg11[%c0_61, %c0_62] : memref<16x32xbf16, #tpu.memory_space<vmem>>, vector<16x32xbf16>
      tpu.vector_store %arg11[%c0_61, %c0_62], %140 {strides = array<i32>} : memref<16x32xbf16, #tpu.memory_space<vmem>>, vector<16x32xbf16>,
    } else {
    }
    %c0_7 = arith.constant 0 : index
    %c0_8 = arith.constant 0 : index
    %c0_9 = arith.constant 0 : index
    %9 = vector.load %arg4[%c0_7, %c0_8, %c0_9] : memref<1x8x32xf32, #tpu.memory_space<vmem>>, vector<1x8x32xf32>
    %10 = vector.shape_cast %9 : vector<1x8x32xf32> to vector<8x32xf32>
    %11 = arith.truncf %10 : vector<8x32xf32> to vector<8x32xbf16>
    %c0_10 = arith.constant 0 : index
    %c0_11 = arith.constant 0 : index
    %12 = vector.load %arg5[%c0_10, %c0_11] : memref<32x32xbf16, #tpu.memory_space<vmem>>, vector<32x32xbf16>
    %cst = arith.constant dense<0.000000e+00> : vector<8x32xf32>
    %13 = tpu.matmul %11, %12, %cst {dimension_numbers = #tpu.dot_dimension_numbers<[1], [0], [0], [1], [0, 0, 1, 1], [], []>} : vector<8x32xbf16>, vector<32x32xbf16>, vector<8x32xf32> -> vector<8x32xf32>
    %14 = vector.broadcast %0 : vector<1x32xf32> to vector<8x32xf32>
    %15 = arith.addf %13, %14 : vector<8x32xf32>
    %16 = arith.truncf %15 : vector<8x32xf32> to vector<8x32xbf16>
    %c0_12 = arith.constant 0 : index
    %c0_13 = arith.constant 0 : index
    %17 = vector.load %arg10[%c0_12, %c0_13] : memref<16x32xbf16, #tpu.memory_space<vmem>>, vector<16x32xbf16>
    %c0_14 = arith.constant 0 : index
    %c0_15 = arith.constant 0 : index
    %18 = vector.load %arg11[%c0_14, %c0_15] : memref<16x32xbf16, #tpu.memory_space<vmem>>, vector<16x32xbf16>
    %c0_16 = arith.constant 0 : index
    %c0_17 = arith.constant 0 : index
    %c0_18 = arith.constant 0 : index
    %19 = vector.load %arg2[%c0_16, %c0_17, %c0_18] : memref<1x1x16xf32, #tpu.memory_space<vmem>>, vector<1x1x16xf32>
    %20 = vector.shape_cast %19 : vector<1x1x16xf32> to vector<1x16xf32>
    %21 = vector.shape_cast %20 : vector<1x16xf32> to vector<1x16xf32>
    %22 = vector.broadcast %21 : vector<1x16xf32> to vector<8x16xf32>
    %23 = vector.extract_strided_slice %16 {offsets = [0, 0], sizes = [8, 8], strides = [1, 1]} : vector<8x32xbf16> to vector<8x8xbf16>
    %24 = vector.extract_strided_slice %17 {offsets = [0, 0], sizes = [16, 8], strides = [1, 1]} : vector<16x32xbf16> to vector<16x8xbf16>
    %25 = vector.extract_strided_slice %18 {offsets = [0, 0], sizes = [16, 8], strides = [1, 1]} : vector<16x32xbf16> to vector<16x8xbf16>
    %cst_19 = arith.constant dense<0.000000e+00> : vector<8x16xf32>
    %26 = tpu.matmul %23, %24, %cst_19 {dimension_numbers = #tpu.dot_dimension_numbers<[1], [1], [0], [0], [0, 0, 1, 0], [], []>} : vector<8x8xbf16>, vector<16x8xbf16>, vector<8x16xf32> -> vector<8x16xf32>
    %27 = arith.addf %26, %22 : vector<8x16xf32>
    %cst_20 = arith.constant dense<0xFF800000> : vector<8xf32>
    %28 = vector.multi_reduction <maximumf>, %27, %cst_20 [1] : vector<8x16xf32> to vector<8xf32>
    %29 = vector.shape_cast %28 : vector<8xf32> to vector<8x1xf32>
    %30 = vector.broadcast %29 : vector<8x1xf32> to vector<8x16xf32>
    %31 = arith.subf %27, %30 : vector<8x16xf32>
    %32 = math.exp %31 : vector<8x16xf32>
    %cst_21 = arith.constant dense<0.000000e+00> : vector<8xf32>
    %33 = vector.multi_reduction <add>, %32, %cst_21 [1] : vector<8x16xf32> to vector<8xf32>
    %34 = vector.shape_cast %33 : vector<8xf32> to vector<8x1xf32>
    %35 = tpu.reciprocal %34 {approx = true} : vector<8x1xf32> -> vector<8x1xf32>
    %36 = vector.broadcast %35 : vector<8x1xf32> to vector<8x16xf32>
    %37 = arith.mulf %32, %36 : vector<8x16xf32>
    %38 = arith.truncf %37 : vector<8x16xf32> to vector<8x16xbf16>
    %cst_22 = arith.constant dense<0.000000e+00> : vector<8x8xf32>
    %39 = tpu.matmul %38, %25, %cst_22 {dimension_numbers = #tpu.dot_dimension_numbers<[1], [0], [0], [1], [0, 0, 1, 1], [], []>} : vector<8x16xbf16>, vector<16x8xbf16>, vector<8x8xf32> -> vector<8x8xf32>
    %40 = arith.truncf %39 : vector<8x8xf32> to vector<8x8xbf16>
    %c0_23 = arith.constant 0 : index
    %c0_24 = arith.constant 0 : index
    %41 = vector.load %arg12[%c0_23, %c0_24] : memref<8x32xbf16, #tpu.memory_space<vmem>>, vector<8x8xbf16>
    tpu.vector_store %arg12[%c0_23, %c0_24], %40 {strides = array<i32>} : memref<8x32xbf16, #tpu.memory_space<vmem>>, vector<8x8xbf16>,
    %42 = vector.extract_strided_slice %16 {offsets = [0, 8], sizes = [8, 8], strides = [1, 1]} : vector<8x32xbf16> to vector<8x8xbf16>
    %43 = vector.extract_strided_slice %17 {offsets = [0, 8], sizes = [16, 8], strides = [1, 1]} : vector<16x32xbf16> to vector<16x8xbf16>
    %44 = vector.extract_strided_slice %18 {offsets = [0, 8], sizes = [16, 8], strides = [1, 1]} : vector<16x32xbf16> to vector<16x8xbf16>
    %cst_25 = arith.constant dense<0.000000e+00> : vector<8x16xf32>
    %45 = tpu.matmul %42, %43, %cst_25 {dimension_numbers = #tpu.dot_dimension_numbers<[1], [1], [0], [0], [0, 0, 1, 0], [], []>} : vector<8x8xbf16>, vector<16x8xbf16>, vector<8x16xf32> -> vector<8x16xf32>
    %46 = arith.addf %45, %22 : vector<8x16xf32>
    %cst_26 = arith.constant dense<0xFF800000> : vector<8xf32>
    %47 = vector.multi_reduction <maximumf>, %46, %cst_26 [1] : vector<8x16xf32> to vector<8xf32>
    %48 = vector.shape_cast %47 : vector<8xf32> to vector<8x1xf32>
    %49 = vector.broadcast %48 : vector<8x1xf32> to vector<8x16xf32>
    %50 = arith.subf %46, %49 : vector<8x16xf32>
    %51 = math.exp %50 : vector<8x16xf32>
    %cst_27 = arith.constant dense<0.000000e+00> : vector<8xf32>
    %52 = vector.multi_reduction <add>, %51, %cst_27 [1] : vector<8x16xf32> to vector<8xf32>
    %53 = vector.shape_cast %52 : vector<8xf32> to vector<8x1xf32>
    %54 = tpu.reciprocal %53 {approx = true} : vector<8x1xf32> -> vector<8x1xf32>
    %55 = vector.broadcast %54 : vector<8x1xf32> to vector<8x16xf32>
    %56 = arith.mulf %51, %55 : vector<8x16xf32>
    %57 = arith.truncf %56 : vector<8x16xf32> to vector<8x16xbf16>
    %cst_28 = arith.constant dense<0.000000e+00> : vector<8x8xf32>
    %58 = tpu.matmul %57, %44, %cst_28 {dimension_numbers = #tpu.dot_dimension_numbers<[1], [0], [0], [1], [0, 0, 1, 1], [], []>} : vector<8x16xbf16>, vector<16x8xbf16>, vector<8x8xf32> -> vector<8x8xf32>
    %59 = arith.truncf %58 : vector<8x8xf32> to vector<8x8xbf16>
    %c0_29 = arith.constant 0 : index
    %c8 = arith.constant 8 : index
    %60 = vector.load %arg12[%c0_29, %c8] : memref<8x32xbf16, #tpu.memory_space<vmem>>, vector<8x8xbf16>
    tpu.vector_store %arg12[%c0_29, %c8], %59 {strides = array<i32>} : memref<8x32xbf16, #tpu.memory_space<vmem>>, vector<8x8xbf16>,
    %61 = vector.extract_strided_slice %16 {offsets = [0, 16], sizes = [8, 8], strides = [1, 1]} : vector<8x32xbf16> to vector<8x8xbf16>
    %62 = vector.extract_strided_slice %17 {offsets = [0, 16], sizes = [16, 8], strides = [1, 1]} : vector<16x32xbf16> to vector<16x8xbf16>
    %63 = vector.extract_strided_slice %18 {offsets = [0, 16], sizes = [16, 8], strides = [1, 1]} : vector<16x32xbf16> to vector<16x8xbf16>
    %cst_30 = arith.constant dense<0.000000e+00> : vector<8x16xf32>
    %64 = tpu.matmul %61, %62, %cst_30 {dimension_numbers = #tpu.dot_dimension_numbers<[1], [1], [0], [0], [0, 0, 1, 0], [], []>} : vector<8x8xbf16>, vector<16x8xbf16>, vector<8x16xf32> -> vector<8x16xf32>
    %65 = arith.addf %64, %22 : vector<8x16xf32>
    %cst_31 = arith.constant dense<0xFF800000> : vector<8xf32>
    %66 = vector.multi_reduction <maximumf>, %65, %cst_31 [1] : vector<8x16xf32> to vector<8xf32>
    %67 = vector.shape_cast %66 : vector<8xf32> to vector<8x1xf32>
    %68 = vector.broadcast %67 : vector<8x1xf32> to vector<8x16xf32>
    %69 = arith.subf %65, %68 : vector<8x16xf32>
    %70 = math.exp %69 : vector<8x16xf32>
    %cst_32 = arith.constant dense<0.000000e+00> : vector<8xf32>
    %71 = vector.multi_reduction <add>, %70, %cst_32 [1] : vector<8x16xf32> to vector<8xf32>
    %72 = vector.shape_cast %71 : vector<8xf32> to vector<8x1xf32>
    %73 = tpu.reciprocal %72 {approx = true} : vector<8x1xf32> -> vector<8x1xf32>
    %74 = vector.broadcast %73 : vector<8x1xf32> to vector<8x16xf32>
    %75 = arith.mulf %70, %74 : vector<8x16xf32>
    %76 = arith.truncf %75 : vector<8x16xf32> to vector<8x16xbf16>
    %cst_33 = arith.constant dense<0.000000e+00> : vector<8x8xf32>
    %77 = tpu.matmul %76, %63, %cst_33 {dimension_numbers = #tpu.dot_dimension_numbers<[1], [0], [0], [1], [0, 0, 1, 1], [], []>} : vector<8x16xbf16>, vector<16x8xbf16>, vector<8x8xf32> -> vector<8x8xf32>
    %78 = arith.truncf %77 : vector<8x8xf32> to vector<8x8xbf16>
    %c0_34 = arith.constant 0 : index
    %c16 = arith.constant 16 : index
    %79 = vector.load %arg12[%c0_34, %c16] : memref<8x32xbf16, #tpu.memory_space<vmem>>, vector<8x8xbf16>
    tpu.vector_store %arg12[%c0_34, %c16], %78 {strides = array<i32>} : memref<8x32xbf16, #tpu.memory_space<vmem>>, vector<8x8xbf16>,
    %80 = vector.extract_strided_slice %16 {offsets = [0, 24], sizes = [8, 8], strides = [1, 1]} : vector<8x32xbf16> to vector<8x8xbf16>
    %81 = vector.extract_strided_slice %17 {offsets = [0, 24], sizes = [16, 8], strides = [1, 1]} : vector<16x32xbf16> to vector<16x8xbf16>
    %82 = vector.extract_strided_slice %18 {offsets = [0, 24], sizes = [16, 8], strides = [1, 1]} : vector<16x32xbf16> to vector<16x8xbf16>
    %cst_35 = arith.constant dense<0.000000e+00> : vector<8x16xf32>
    %83 = tpu.matmul %80, %81, %cst_35 {dimension_numbers = #tpu.dot_dimension_numbers<[1], [1], [0], [0], [0, 0, 1, 0], [], []>} : vector<8x8xbf16>, vector<16x8xbf16>, vector<8x16xf32> -> vector<8x16xf32>
    %84 = arith.addf %83, %22 : vector<8x16xf32>
    %cst_36 = arith.constant dense<0xFF800000> : vector<8xf32>
    %85 = vector.multi_reduction <maximumf>, %84, %cst_36 [1] : vector<8x16xf32> to vector<8xf32>
    %86 = vector.shape_cast %85 : vector<8xf32> to vector<8x1xf32>
    %87 = vector.broadcast %86 : vector<8x1xf32> to vector<8x16xf32>
    %88 = arith.subf %84, %87 : vector<8x16xf32>
    %89 = math.exp %88 : vector<8x16xf32>
    %cst_37 = arith.constant dense<0.000000e+00> : vector<8xf32>
    %90 = vector.multi_reduction <add>, %89, %cst_37 [1] : vector<8x16xf32> to vector<8xf32>
    %91 = vector.shape_cast %90 : vector<8xf32> to vector<8x1xf32>
    %92 = tpu.reciprocal %91 {approx = true} : vector<8x1xf32> -> vector<8x1xf32>
    %93 = vector.broadcast %92 : vector<8x1xf32> to vector<8x16xf32>
    %94 = arith.mulf %89, %93 : vector<8x16xf32>
    %95 = arith.truncf %94 : vector<8x16xf32> to vector<8x16xbf16>
    %cst_38 = arith.constant dense<0.000000e+00> : vector<8x8xf32>
    %96 = tpu.matmul %95, %82, %cst_38 {dimension_numbers = #tpu.dot_dimension_numbers<[1], [0], [0], [1], [0, 0, 1, 1], [], []>} : vector<8x16xbf16>, vector<16x8xbf16>, vector<8x8xf32> -> vector<8x8xf32>
    %97 = arith.truncf %96 : vector<8x8xf32> to vector<8x8xbf16>
    %c0_39 = arith.constant 0 : index
    %c24 = arith.constant 24 : index
    %98 = vector.load %arg12[%c0_39, %c24] : memref<8x32xbf16, #tpu.memory_space<vmem>>, vector<8x8xbf16>
    tpu.vector_store %arg12[%c0_39, %c24], %97 {strides = array<i32>} : memref<8x32xbf16, #tpu.memory_space<vmem>>, vector<8x8xbf16>,
    %c0_40 = arith.constant 0 : index
    %c0_41 = arith.constant 0 : index
    %99 = vector.load %arg12[%c0_40, %c0_41] : memref<8x32xbf16, #tpu.memory_space<vmem>>, vector<8x32xbf16>
    %c0_42 = arith.constant 0 : index
    %c0_43 = arith.constant 0 : index
    %100 = vector.load %arg7[%c0_42, %c0_43] : memref<32x32xbf16, #tpu.memory_space<vmem>>, vector<32x32xbf16>
    %cst_44 = arith.constant dense<0.000000e+00> : vector<8x32xf32>
    %101 = tpu.matmul %99, %100, %cst_44 {dimension_numbers = #tpu.dot_dimension_numbers<[1], [0], [0], [1], [0, 0, 1, 1], [], []>} : vector<8x32xbf16>, vector<32x32xbf16>, vector<8x32xf32> -> vector<8x32xf32>
    %102 = vector.broadcast %3 : vector<1x32xf32> to vector<8x32xf32>
    %103 = arith.addf %101, %102 : vector<8x32xf32>
    %104 = arith.addf %103, %10 : vector<8x32xf32>
    %cst_45 = arith.constant dense<0.000000e+00> : vector<8xf32>
    %105 = vector.multi_reduction <add>, %104, %cst_45 [1] : vector<8x32xf32> to vector<8xf32>
    %106 = vector.shape_cast %105 : vector<8xf32> to vector<8x1xf32>
    %cst_46 = arith.constant 3.200000e+01 : f32
    %107 = vector.broadcast %cst_46 : f32 to vector<8x1xf32>
    %108 = arith.divf %106, %107 : vector<8x1xf32>
    %109 = vector.broadcast %108 : vector<8x1xf32> to vector<8x32xf32>
    %110 = arith.subf %104, %109 : vector<8x32xf32>
    %111 = arith.mulf %110, %110 : vector<8x32xf32>
    %cst_47 = arith.constant dense<0.000000e+00> : vector<8xf32>
    %112 = vector.multi_reduction <add>, %111, %cst_47 [1] : vector<8x32xf32> to vector<8xf32>
    %113 = vector.shape_cast %112 : vector<8xf32> to vector<8x1xf32>
    %cst_48 = arith.constant 3.200000e+01 : f32
    %114 = vector.broadcast %cst_48 : f32 to vector<8x1xf32>
    %115 = arith.divf %113, %114 : vector<8x1xf32>
    %cst_49 = arith.constant 9.99999996E-13 : f32
    %116 = vector.broadcast %cst_49 : f32 to vector<8x1xf32>
    %117 = arith.addf %115, %116 : vector<8x1xf32>
    %118 = math.rsqrt %117 : vector<8x1xf32>
    %119 = vector.broadcast %118 : vector<8x1xf32> to vector<8x32xf32>
    %120 = arith.mulf %110, %119 : vector<8x32xf32>
    %121 = vector.broadcast %4 : vector<1x32xf32> to vector<8x32xf32>
    %122 = arith.mulf %121, %120 : vector<8x32xf32>
    %123 = vector.broadcast %5 : vector<1x32xf32> to vector<8x32xf32>
    %124 = arith.addf %122, %123 : vector<8x32xf32>
    %c0_50 = arith.constant 0 : index
    %c0_51 = arith.constant 0 : index
    %c0_52 = arith.constant 0 : index
    %125 = vector.load %arg9[%c0_50, %c0_51, %c0_52] : memref<1x8x32xf32, #tpu.memory_space<vmem>>, vector<1x8x32xf32>
    %126 = vector.shape_cast %125 : vector<1x8x32xf32> to vector<8x32xf32>
    %127 = vector.shape_cast %124 : vector<8x32xf32> to vector<1x8x32xf32>
    tpu.vector_store %arg9[%c0_50, %c0_51, %c0_52], %127 {strides = array<i32>} : memref<1x8x32xf32, #tpu.memory_space<vmem>>, vector<1x8x32xf32>,
    return
  }
  func.func @transform_0(%arg0: i32, %arg1: i32) -> (i32, i32, i32) {
    %c0_i32 = arith.constant 0 : i32
    %c0_i32_0 = arith.constant 0 : i32
    %c0_i32_1 = arith.constant 0 : i32
    return %arg0, %c0_i32, %c0_i32_0 : i32, i32, i32
  }
  func.func @transform_1(%arg0: i32, %arg1: i32) -> (i32, i32, i32) {
    %c0_i32 = arith.constant 0 : i32
    %c0_i32_0 = arith.constant 0 : i32
    %c0_i32_1 = arith.constant 0 : i32
    return %arg0, %c0_i32, %c0_i32_0 : i32, i32, i32
  }
  func.func @transform_2(%arg0: i32, %arg1: i32) -> (i32, i32, i32) {
    %c0_i32 = arith.constant 0 : i32
    %c0_i32_0 = arith.constant 0 : i32
    return %arg0, %arg1, %c0_i32 : i32, i32, i32
  }
  func.func @transform_3(%arg0: i32, %arg1: i32) -> (i32, i32) {
    %c0_i32 = arith.constant 0 : i32
    %c0_i32_0 = arith.constant 0 : i32
    %c0_i32_1 = arith.constant 0 : i32
    return %c0_i32, %c0_i32_0 : i32, i32
  }
  func.func @transform_4(%arg0: i32, %arg1: i32) -> (i32, i32) {
    %c0_i32 = arith.constant 0 : i32
    %c0_i32_0 = arith.constant 0 : i32
    %c0_i32_1 = arith.constant 0 : i32
    return %c0_i32, %c0_i32_0 : i32, i32
  }
  func.func @transform_5(%arg0: i32, %arg1: i32) -> (i32, i32) {
    %c0_i32 = arith.constant 0 : i32
    %c0_i32_0 = arith.constant 0 : i32
    %c0_i32_1 = arith.constant 0 : i32
    return %c0_i32, %c0_i32_0 : i32, i32
  }
  func.func @transform_6(%arg0: i32, %arg1: i32) -> (i32, i32) {
    %c0_i32 = arith.constant 0 : i32
    %c0_i32_0 = arith.constant 0 : i32
    %c0_i32_1 = arith.constant 0 : i32
    return %c0_i32, %c0_i32_0 : i32, i32
  }
  func.func @transform_7(%arg0: i32, %arg1: i32) -> (i32, i32, i32) {
    %c0_i32 = arith.constant 0 : i32
    %c0_i32_0 = arith.constant 0 : i32
    return %arg0, %arg1, %c0_i32 : i32, i32, i32
  }
}

module attributes {stable_mosaic.version = 11 : i64} {
  func.func @attention_kernel(%arg0: i32, %arg1: i32, %arg2: memref<1x1x16xf32, #tpu.memory_space<vmem>>, %arg3: memref<1x16x32xbf16, #tpu.memory_space<vmem>>, %arg4: memref<1x8x32xf32, #tpu.memory_space<vmem>>, %arg5: memref<32x32xbf16, #tpu.memory_space<vmem>>, %arg6: memref<32x64xbf16, #tpu.memory_space<vmem>>, %arg7: memref<32x32xbf16, #tpu.memory_space<vmem>>, %arg8: memref<6x32xf32, #tpu.memory_space<vmem>>, %arg9: memref<1x8x32xf32, #tpu.memory_space<vmem>>, %arg10: memref<16x32xbf16, #tpu.memory_space<vmem>>, %arg11: memref<16x32xbf16, #tpu.memory_space<vmem>>, %arg12: memref<8x32xbf16, #tpu.memory_space<vmem>>) attributes {dimension_semantics = [#tpu.dimension_semantics<parallel>, #tpu.dimension_semantics<arbitrary>], iteration_bounds = array<i64: 2, 2>, scalar_prefetch = 0 : i64, scratch_operands = 3 : i64, tpu.core_type = #tpu.core_type<tc>, window_params = [{transform_indices = @transform_0, window_bounds = array<i64: 1, 1, 16>}, {transform_indices = @transform_1, window_bounds = array<i64: 1, 16, 32>}, {transform_indices = @transform_2, window_bounds = array<i64: 1, 8, 32>}, {pipeline_mode = #tpu.pipeline_mode<synchronous>, transform_indices = @transform_3, window_bounds = array<i64: 32, 32>}, {pipeline_mode = #tpu.pipeline_mode<synchronous>, transform_indices = @transform_4, window_bounds = array<i64: 32, 64>}, {pipeline_mode = #tpu.pipeline_mode<synchronous>, transform_indices = @transform_5, window_bounds = array<i64: 32, 32>}, {pipeline_mode = #tpu.pipeline_mode<synchronous>, transform_indices = @transform_6, window_bounds = array<i64: 6, 32>}, {transform_indices = @transform_7, window_bounds = array<i64: 1, 8, 32>}]} {
    %c0 = arith.constant 0 : index
    %c0_0 = arith.constant 0 : index
    %0 = vector.load %arg8[%c0, %c0_0] : memref<6x32xf32, #tpu.memory_space<vmem>>, vector<1x32xf32>
    %c1 = arith.constant 1 : index
    %c0_1 = arith.constant 0 : index
    %1 = vector.load %arg8[%c1, %c0_1] : memref<6x32xf32, #tpu.memory_space<vmem>>, vector<1x32xf32>
    %c2 = arith.constant 2 : index
    %c0_2 = arith.constant 0 : index
    %2 = vector.load %arg8[%c2, %c0_2] : memref<6x32xf32, #tpu.memory_space<vmem>>, vector<1x32xf32>
    %c3 = arith.constant 3 : index
    %c0_3 = arith.constant 0 : index
    %3 = vector.load %arg8[%c3, %c0_3] : memref<6x32xf32, #tpu.memory_space<vmem>>, vector<1x32xf32>
    %c4 = arith.constant 4 : index
    %c0_4 = arith.constant 0 : index
    %4 = vector.load %arg8[%c4, %c0_4] : memref<6x32xf32, #tpu.memory_space<vmem>>, vector<1x32xf32>
    %c5 = arith.constant 5 : index
    %c0_5 = arith.constant 0 : index
    %5 = vector.load %arg8[%c5, %c0_5] : memref<6x32xf32, #tpu.memory_space<vmem>>, vector<1x32xf32>
    %c0_i32 = arith.constant 0 : i32
    %6 = arith.cmpi eq, %arg1, %c0_i32 : i32
    %7 = arith.extui %6 : i1 to i32
    %c0_i32_6 = arith.constant 0 : i32
    %8 = arith.cmpi ne, %7, %c0_i32_6 : i32
    scf.if %8 {
      %c0_53 = arith.constant 0 : index
      %c0_54 = arith.constant 0 : index
      %c0_55 = arith.constant 0 : index
      %128 = vector.load %arg3[%c0_53, %c0_54, %c0_55] : memref<1x16x32xbf16, #tpu.memory_space<vmem>>, vector<1x16x32xbf16>
      %129 = vector.shape_cast %128 : vector<1x16x32xbf16> to vector<16x32xbf16>
      %c0_56 = arith.constant 0 : index
      %c0_57 = arith.constant 0 : index
      %130 = vector.load %arg6[%c0_56, %c0_57] : memref<32x64xbf16, #tpu.memory_space<vmem>>, vector<32x64xbf16>
      %cst_58 = arith.constant dense<0.000000e+00> : vector<16x64xf32>
      %131 = tpu.matmul %129, %130, %cst_58 {dimension_numbers = #tpu.dot_dimension_numbers<[1], [0], [0], [1], [0, 0, 1, 1], [], []>} : vector<16x32xbf16>, vector<32x64xbf16>, vector<16x64xf32> -> vector<16x64xf32>
      %132 = vector.extract_strided_slice %131 {offsets = [0, 0], sizes = [16, 32], strides = [1, 1]} : vector<16x64xf32> to vector<16x32xf32>
      %133 = vector.broadcast %1 : vector<1x32xf32> to vector<16x32xf32>
      %134 = arith.addf %132, %133 : vector<16x32xf32>
      %135 = arith.truncf %134 : vector<16x32xf32> to vector<16x32xbf16>
      %c0_59 = arith.constant 0 : index
      %c0_60 = arith.constant 0 : index
      %136 = vector.load %arg10[%c0_59, %c0_60] : memref<16x32xbf16, #tpu.memory_space<vmem>>, vector<16x32xbf16>
      tpu.vector_store %arg10[%c0_59, %c0_60], %135 {strides = array<i32>} : memref<16x32xbf16, #tpu.memory_space<vmem>>, vector<16x32xbf16>,
      %137 = vector.extract_strided_slice %131 {offsets = [0, 32], sizes = [16, 32], strides = [1, 1]} : vector<16x64xf32> to vector<16x32xf32>
      %138 = vector.broadcast %2 : vector<1x32xf32> to vector<16x32xf32>
      %139 = arith.addf %137, %138 : vector<16x32xf32>
      %140 = arith.truncf %139 : vector<16x32xf32> to vector<16x32xbf16>
      %c0_61 = arith.constant 0 : index
      %c0_62 = arith.constant 0 : index
      %141 = vector.load %arg11[%c0_61, %c0_62] : memref<16x32xbf16, #tpu.memory_space<vmem>>, vector<16x32xbf16>
      tpu.vector_store %arg11[%c0_61, %c0_62], %140 {strides = array<i32>} : memref<16x32xbf16, #tpu.memory_space<vmem>>, vector<16x32xbf16>,
    } else {
    }
    %c0_7 = arith.constant 0 : index
    %c0_8 = arith.constant 0 : index
    %c0_9 = arith.constant 0 : index
    %9 = vector.load %arg4[%c0_7, %c0_8, %c0_9] : memref<1x8x32xf32, #tpu.memory_space<vmem>>, vector<1x8x32xf32>
    %10 = vector.shape_cast %9 : vector<1x8x32xf32> to vector<8x32xf32>
    %11 = arith.truncf %10 : vector<8x32xf32> to vector<8x32xbf16>
    %c0_10 = arith.constant 0 : index
    %c0_11 = arith.constant 0 : index
    %12 = vector.load %arg5[%c0_10, %c0_11] : memref<32x32xbf16, #tpu.memory_space<vmem>>, vector<32x32xbf16>
    %cst = arith.constant dense<0.000000e+00> : vector<8x32xf32>
    %13 = tpu.matmul %11, %12, %cst {dimension_numbers = #tpu.dot_dimension_numbers<[1], [0], [0], [1], [0, 0, 1, 1], [], []>} : vector<8x32xbf16>, vector<32x32xbf16>, vector<8x32xf32> -> vector<8x32xf32>
    %14 = vector.broadcast %0 : vector<1x32xf32> to vector<8x32xf32>
    %15 = arith.addf %13, %14 : vector<8x32xf32>
    %16 = arith.truncf %15 : vector<8x32xf32> to vector<8x32xbf16>
    %c0_12 = arith.constant 0 : index
    %c0_13 = arith.constant 0 : index
    %17 = vector.load %arg10[%c0_12, %c0_13] : memref<16x32xbf16, #tpu.memory_space<vmem>>, vector<16x32xbf16>
    %c0_14 = arith.constant 0 : index
    %c0_15 = arith.constant 0 : index
    %18 = vector.load %arg11[%c0_14, %c0_15] : memref<16x32xbf16, #tpu.memory_space<vmem>>, vector<16x32xbf16>
    %c0_16 = arith.constant 0 : index
    %c0_17 = arith.constant 0 : index
    %c0_18 = arith.constant 0 : index
    %19 = vector.load %arg2[%c0_16, %c0_17, %c0_18] : memref<1x1x16xf32, #tpu.memory_space<vmem>>, vector<1x1x16xf32>
    %20 = vector.shape_cast %19 : vector<1x1x16xf32> to vector<1x16xf32>
    %21 = vector.shape_cast %20 : vector<1x16xf32> to vector<1x16xf32>
    %22 = vector.broadcast %21 : vector<1x16xf32> to vector<8x16xf32>
    %23 = vector.extract_strided_slice %16 {offsets = [0, 0], sizes = [8, 8], strides = [1, 1]} : vector<8x32xbf16> to vector<8x8xbf16>
    %24 = vector.extract_strided_slice %17 {offsets = [0, 0], sizes = [16, 8], strides = [1, 1]} : vector<16x32xbf16> to vector<16x8xbf16>
    %25 = vector.extract_strided_slice %18 {offsets = [0, 0], sizes = [16, 8], strides = [1, 1]} : vector<16x32xbf16> to vector<16x8xbf16>
    %cst_19 = arith.constant dense<0.000000e+00> : vector<8x16xf32>
    %26 = tpu.matmul %23, %24, %cst_19 {dimension_numbers = #tpu.dot_dimension_numbers<[1], [1], [0], [0], [0, 0, 1, 0], [], []>} : vector<8x8xbf16>, vector<16x8xbf16>, vector<8x16xf32> -> vector<8x16xf32>
    %27 = arith.addf %26, %22 : vector<8x16xf32>
    %cst_20 = arith.constant dense<0xFF800000> : vector<8xf32>
    %28 = vector.multi_reduction <maximumf>, %27, %cst_20 [1] : vector<8x16xf32> to vector<8xf32>
    %29 = vector.shape_cast %28 : vector<8xf32> to vector<8x1xf32>
    %30 = vector.broadcast %29 : vector<8x1xf32> to vector<8x16xf32>
    %31 = arith.subf %27, %30 : vector<8x16xf32>
    %32 = math.exp %31 : vector<8x16xf32>
    %cst_21 = arith.constant dense<0.000000e+00> : vector<8xf32>
    %33 = vector.multi_reduction <add>, %32, %cst_21 [1] : vector<8x16xf32> to vector<8xf32>
    %34 = vector.shape_cast %33 : vector<8xf32> to vector<8x1xf32>
    %35 = tpu.reciprocal %34 {approx = true} : vector<8x1xf32> -> vector<8x1xf32>
    %36 = vector.broadcast %35 : vector<8x1xf32> to vector<8x16xf32>
    %37 = arith.mulf %32, %36 : vector<8x16xf32>
    %38 = arith.truncf %37 : vector<8x16xf32> to vector<8x16xbf16>
    %cst_22 = arith.constant dense<0.000000e+00> : vector<8x8xf32>
    %39 = tpu.matmul %38, %25, %cst_22 {dimension_numbers = #tpu.dot_dimension_numbers<[1], [0], [0], [1], [0, 0, 1, 1], [], []>} : vector<8x16xbf16>, vector<16x8xbf16>, vector<8x8xf32> -> vector<8x8xf32>
    %40 = arith.truncf %39 : vector<8x8xf32> to vector<8x8xbf16>
    %c0_23 = arith.constant 0 : index
    %c0_24 = arith.constant 0 : index
    %41 = vector.load %arg12[%c0_23, %c0_24] : memref<8x32xbf16, #tpu.memory_space<vmem>>, vector<8x8xbf16>
    tpu.vector_store %arg12[%c0_23, %c0_24], %40 {strides = array<i32>} : memref<8x32xbf16, #tpu.memory_space<vmem>>, vector<8x8xbf16>,
    %42 = vector.extract_strided_slice %16 {offsets = [0, 8], sizes = [8, 8], strides = [1, 1]} : vector<8x32xbf16> to vector<8x8xbf16>
    %43 = vector.extract_strided_slice %17 {offsets = [0, 8], sizes = [16, 8], strides = [1, 1]} : vector<16x32xbf16> to vector<16x8xbf16>
    %44 = vector.extract_strided_slice %18 {offsets = [0, 8], sizes = [16, 8], strides = [1, 1]} : vector<16x32xbf16> to vector<16x8xbf16>
    %cst_25 = arith.constant dense<0.000000e+00> : vector<8x16xf32>
    %45 = tpu.matmul %42, %43, %cst_25 {dimension_numbers = #tpu.dot_dimension_numbers<[1], [1], [0], [0], [0, 0, 1, 0], [], []>} : vector<8x8xbf16>, vector<16x8xbf16>, vector<8x16xf32> -> vector<8x16xf32>
    %46 = arith.addf %45, %22 : vector<8x16xf32>
    %cst_26 = arith.constant dense<0xFF800000> : vector<8xf32>
    %47 = vector.multi_reduction <maximumf>, %46, %cst_26 [1] : vector<8x16xf32> to vector<8xf32>
    %48 = vector.shape_cast %47 : vector<8xf32> to vector<8x1xf32>
    %49 = vector.broadcast %48 : vector<8x1xf32> to vector<8x16xf32>
    %50 = arith.subf %46, %49 : vector<8x16xf32>
    %51 = math.exp %50 : vector<8x16xf32>
    %cst_27 = arith.constant dense<0.000000e+00> : vector<8xf32>
    %52 = vector.multi_reduction <add>, %51, %cst_27 [1] : vector<8x16xf32> to vector<8xf32>
    %53 = vector.shape_cast %52 : vector<8xf32> to vector<8x1xf32>
    %54 = tpu.reciprocal %53 {approx = true} : vector<8x1xf32> -> vector<8x1xf32>
    %55 = vector.broadcast %54 : vector<8x1xf32> to vector<8x16xf32>
    %56 = arith.mulf %51, %55 : vector<8x16xf32>
    %57 = arith.truncf %56 : vector<8x16xf32> to vector<8x16xbf16>
    %cst_28 = arith.constant dense<0.000000e+00> : vector<8x8xf32>
    %58 = tpu.matmul %57, %44, %cst_28 {dimension_numbers = #tpu.dot_dimension_numbers<[1], [0], [0], [1], [0, 0, 1, 1], [], []>} : vector<8x16xbf16>, vector<16x8xbf16>, vector<8x8xf32> -> vector<8x8xf32>
    %59 = arith.truncf %58 : vector<8x8xf32> to vector<8x8xbf16>
    %c0_29 = arith.constant 0 : index
    %c8 = arith.constant 8 : index
    %60 = vector.load %arg12[%c0_29, %c8] : memref<8x32xbf16, #tpu.memory_space<vmem>>, vector<8x8xbf16>
    tpu.vector_store %arg12[%c0_29, %c8], %59 {strides = array<i32>} : memref<8x32xbf16, #tpu.memory_space<vmem>>, vector<8x8xbf16>,
    %61 = vector.extract_strided_slice %16 {offsets = [0, 16], sizes = [8, 8], strides = [1, 1]} : vector<8x32xbf16> to vector<8x8xbf16>
    %62 = vector.extract_strided_slice %17 {offsets = [0, 16], sizes = [16, 8], strides = [1, 1]} : vector<16x32xbf16> to vector<16x8xbf16>
    %63 = vector.extract_strided_slice %18 {offsets = [0, 16], sizes = [16, 8], strides = [1, 1]} : vector<16x32xbf16> to vector<16x8xbf16>
    %cst_30 = arith.constant dense<0.000000e+00> : vector<8x16xf32>
    %64 = tpu.matmul %61, %62, %cst_30 {dimension_numbers = #tpu.dot_dimension_numbers<[1], [1], [0], [0], [0, 0, 1, 0], [], []>} : vector<8x8xbf16>, vector<16x8xbf16>, vector<8x16xf32> -> vector<8x16xf32>
    %65 = arith.addf %64, %22 : vector<8x16xf32>
    %cst_31 = arith.constant dense<0xFF800000> : vector<8xf32>
    %66 = vector.multi_reduction <maximumf>, %65, %cst_31 [1] : vector<8x16xf32> to vector<8xf32>
    %67 = vector.shape_cast %66 : vector<8xf32> to vector<8x1xf32>
    %68 = vector.broadcast %67 : vector<8x1xf32> to vector<8x16xf32>
    %69 = arith.subf %65, %68 : vector<8x16xf32>
    %70 = math.exp %69 : vector<8x16xf32>
    %cst_32 = arith.constant dense<0.000000e+00> : vector<8xf32>
    %71 = vector.multi_reduction <add>, %70, %cst_32 [1] : vector<8x16xf32> to vector<8xf32>
    %72 = vector.shape_cast %71 : vector<8xf32> to vector<8x1xf32>
    %73 = tpu.reciprocal %72 {approx = true} : vector<8x1xf32> -> vector<8x1xf32>
    %74 = vector.broadcast %73 : vector<8x1xf32> to vector<8x16xf32>
    %75 = arith.mulf %70, %74 : vector<8x16xf32>
    %76 = arith.truncf %75 : vector<8x16xf32> to vector<8x16xbf16>
    %cst_33 = arith.constant dense<0.000000e+00> : vector<8x8xf32>
    %77 = tpu.matmul %76, %63, %cst_33 {dimension_numbers = #tpu.dot_dimension_numbers<[1], [0], [0], [1], [0, 0, 1, 1], [], []>} : vector<8x16xbf16>, vector<16x8xbf16>, vector<8x8xf32> -> vector<8x8xf32>
    %78 = arith.truncf %77 : vector<8x8xf32> to vector<8x8xbf16>
    %c0_34 = arith.constant 0 : index
    %c16 = arith.constant 16 : index
    %79 = vector.load %arg12[%c0_34, %c16] : memref<8x32xbf16, #tpu.memory_space<vmem>>, vector<8x8xbf16>
    tpu.vector_store %arg12[%c0_34, %c16], %78 {strides = array<i32>} : memref<8x32xbf16, #tpu.memory_space<vmem>>, vector<8x8xbf16>,
    %80 = vector.extract_strided_slice %16 {offsets = [0, 24], sizes = [8, 8], strides = [1, 1]} : vector<8x32xbf16> to vector<8x8xbf16>
    %81 = vector.extract_strided_slice %17 {offsets = [0, 24], sizes = [16, 8], strides = [1, 1]} : vector<16x32xbf16> to vector<16x8xbf16>
    %82 = vector.extract_strided_slice %18 {offsets = [0, 24], sizes = [16, 8], strides = [1, 1]} : vector<16x32xbf16> to vector<16x8xbf16>
    %cst_35 = arith.constant dense<0.000000e+00> : vector<8x16xf32>
    %83 = tpu.matmul %80, %81, %cst_35 {dimension_numbers = #tpu.dot_dimension_numbers<[1], [1], [0], [0], [0, 0, 1, 0], [], []>} : vector<8x8xbf16>, vector<16x8xbf16>, vector<8x16xf32> -> vector<8x16xf32>
    %84 = arith.addf %83, %22 : vector<8x16xf32>
    %cst_36 = arith.constant dense<0xFF800000> : vector<8xf32>
    %85 = vector.multi_reduction <maximumf>, %84, %cst_36 [1] : vector<8x16xf32> to vector<8xf32>
    %86 = vector.shape_cast %85 : vector<8xf32> to vector<8x1xf32>
    %87 = vector.broadcast %86 : vector<8x1xf32> to vector<8x16xf32>
    %88 = arith.subf %84, %87 : vector<8x16xf32>
    %89 = math.exp %88 : vector<8x16xf32>
    %cst_37 = arith.constant dense<0.000000e+00> : vector<8xf32>
    %90 = vector.multi_reduction <add>, %89, %cst_37 [1] : vector<8x16xf32> to vector<8xf32>
    %91 = vector.shape_cast %90 : vector<8xf32> to vector<8x1xf32>
    %92 = tpu.reciprocal %91 {approx = true} : vector<8x1xf32> -> vector<8x1xf32>
    %93 = vector.broadcast %92 : vector<8x1xf32> to vector<8x16xf32>
    %94 = arith.mulf %89, %93 : vector<8x16xf32>
    %95 = arith.truncf %94 : vector<8x16xf32> to vector<8x16xbf16>
    %cst_38 = arith.constant dense<0.000000e+00> : vector<8x8xf32>
    %96 = tpu.matmul %95, %82, %cst_38 {dimension_numbers = #tpu.dot_dimension_numbers<[1], [0], [0], [1], [0, 0, 1, 1], [], []>} : vector<8x16xbf16>, vector<16x8xbf16>, vector<8x8xf32> -> vector<8x8xf32>
    %97 = arith.truncf %96 : vector<8x8xf32> to vector<8x8xbf16>
    %c0_39 = arith.constant 0 : index
    %c24 = arith.constant 24 : index
    %98 = vector.load %arg12[%c0_39, %c24] : memref<8x32xbf16, #tpu.memory_space<vmem>>, vector<8x8xbf16>
    tpu.vector_store %arg12[%c0_39, %c24], %97 {strides = array<i32>} : memref<8x32xbf16, #tpu.memory_space<vmem>>, vector<8x8xbf16>,
    %c0_40 = arith.constant 0 : index
    %c0_41 = arith.constant 0 : index
    %99 = vector.load %arg12[%c0_40, %c0_41] : memref<8x32xbf16, #tpu.memory_space<vmem>>, vector<8x32xbf16>
    %c0_42 = arith.constant 0 : index
    %c0_43 = arith.constant 0 : index
    %100 = vector.load %arg7[%c0_42, %c0_43] : memref<32x32xbf16, #tpu.memory_space<vmem>>, vector<32x32xbf16>
    %cst_44 = arith.constant dense<0.000000e+00> : vector<8x32xf32>
    %101 = tpu.matmul %99, %100, %cst_44 {dimension_numbers = #tpu.dot_dimension_numbers<[1], [0], [0], [1], [0, 0, 1, 1], [], []>} : vector<8x32xbf16>, vector<32x32xbf16>, vector<8x32xf32> -> vector<8x32xf32>
    %102 = vector.broadcast %3 : vector<1x32xf32> to vector<8x32xf32>
    %103 = arith.addf %101, %102 : vector<8x32xf32>
    %104 = arith.addf %103, %10 : vector<8x32xf32>
    %cst_45 = arith.constant dense<0.000000e+00> : vector<8xf32>
    %105 = vector.multi_reduction <add>, %104, %cst_45 [1] : vector<8x32xf32> to vector<8xf32>
    %106 = vector.shape_cast %105 : vector<8xf32> to vector<8x1xf32>
    %cst_46 = arith.constant 3.200000e+01 : f32
    %107 = vector.broadcast %cst_46 : f32 to vector<8x1xf32>
    %108 = arith.divf %106, %107 : vector<8x1xf32>
    %109 = vector.broadcast %108 : vector<8x1xf32> to vector<8x32xf32>
    %110 = arith.subf %104, %109 : vector<8x32xf32>
    %111 = arith.mulf %110, %110 : vector<8x32xf32>
    %cst_47 = arith.constant dense<0.000000e+00> : vector<8xf32>
    %112 = vector.multi_reduction <add>, %111, %cst_47 [1] : vector<8x32xf32> to vector<8xf32>
    %113 = vector.shape_cast %112 : vector<8xf32> to vector<8x1xf32>
    %cst_48 = arith.constant 3.200000e+01 : f32
    %114 = vector.broadcast %cst_48 : f32 to vector<8x1xf32>
    %115 = arith.divf %113, %114 : vector<8x1xf32>
    %cst_49 = arith.constant 9.99999996E-13 : f32
    %116 = vector.broadcast %cst_49 : f32 to vector<8x1xf32>
    %117 = arith.addf %115, %116 : vector<8x1xf32>
    %118 = math.rsqrt %117 : vector<8x1xf32>
    %119 = vector.broadcast %118 : vector<8x1xf32> to vector<8x32xf32>
    %120 = arith.mulf %110, %119 : vector<8x32xf32>
    %121 = vector.broadcast %4 : vector<1x32xf32> to vector<8x32xf32>
    %122 = arith.mulf %121, %120 : vector<8x32xf32>
    %123 = vector.broadcast %5 : vector<1x32xf32> to vector<8x32xf32>
    %124 = arith.addf %122, %123 : vector<8x32xf32>
    %c0_50 = arith.constant 0 : index
    %c0_51 = arith.constant 0 : index
    %c0_52 = arith.constant 0 : index
    %125 = vector.load %arg9[%c0_50, %c0_51, %c0_52] : memref<1x8x32xf32, #tpu.memory_space<vmem>>, vector<1x8x32xf32>
    %126 = vector.shape_cast %125 : vector<1x8x32xf32> to vector<8x32xf32>
    %127 = vector.shape_cast %124 : vector<8x32xf32> to vector<1x8x32xf32>
    tpu.vector_store %arg9[%c0_50, %c0_51, %c0_52], %127 {strides = array<i32>} : memref<1x8x32xf32, #tpu.memory_space<vmem>>, vector<1x8x32xf32>,
    return
  }
  func.func @transform_0(%arg0: i32, %arg1: i32) -> (i32, i32, i32) {
    %c0_i32 = arith.constant 0 : i32
    %c0_i32_0 = arith.constant 0 : i32
    %c0_i32_1 = arith.constant 0 : i32
    return %arg0, %c0_i32, %c0_i32_0 : i32, i32, i32
  }
  func.func @transform_1(%arg0: i32, %arg1: i32) -> (i32, i32, i32) {
    %c0_i32 = arith.constant 0 : i32
    %c0_i32_0 = arith.constant 0 : i32
    %c0_i32_1 = arith.constant 0 : i32
    return %arg0, %c0_i32, %c0_i32_0 : i32, i32, i32
  }
  func.func @transform_2(%arg0: i32, %arg1: i32) -> (i32, i32, i32) {
    %c0_i32 = arith.constant 0 : i32
    %c0_i32_0 = arith.constant 0 : i32
    return %arg0, %arg1, %c0_i32 : i32, i32, i32
  }
  func.func @transform_3(%arg0: i32, %arg1: i32) -> (i32, i32) {
    %c0_i32 = arith.constant 0 : i32
    %c0_i32_0 = arith.constant 0 : i32
    %c0_i32_1 = arith.constant 0 : i32
    return %c0_i32, %c0_i32_0 : i32, i32
  }
  func.func @transform_4(%arg0: i32, %arg1: i32) -> (i32, i32) {
    %c0_i32 = arith.constant 0 : i32
    %c0_i32_0 = arith.constant 0 : i32
    %c0_i32_1 = arith.constant 0 : i32
    return %c0_i32, %c0_i32_0 : i32, i32
  }
  func.func @transform_5(%arg0: i32, %arg1: i32) -> (i32, i32) {
    %c0_i32 = arith.constant 0 : i32
    %c0_i32_0 = arith.constant 0 : i32
    %c0_i32_1 = arith.constant 0 : i32
    return %c0_i32, %c0_i32_0 : i32, i32
  }
  func.func @transform_6(%arg0: i32, %arg1: i32) -> (i32, i32) {
    %c0_i32 = arith.constant 0 : i32
    %c0_i32_0 = arith.constant 0 : i32
    %c0_i32_1 = arith.constant 0 : i32
    return %c0_i32, %c0_i32_0 : i32, i32
  }
  func.func @transform_7(%arg0: i32, %arg1: i32) -> (i32, i32, i32) {
    %c0_i32 = arith.constant 0 : i32
    %c0_i32_0 = arith.constant 0 : i32
    return %arg0, %arg1, %c0_i32 : i32, i32, i32
  }
}

</mosaic_0001>

<bundles_post_ra>
// kernel: tpu_custom_call.1
= control target key start
LH: loop header
LB: loop body
LE: loop exit
PB: predicated region body
PF: predicated region fallthrough
CT: control target
= control target key end

     0   :  { %s2500_s0 = inlined_call_operand.hbm [shape: f32[2,1,16], index: 0, kind: input, shape index: {}]   ;;  %s2501_s1 = inlined_call_operand.hbm [shape: bf16[2,16,32], index: 1, kind: input, shape index: {}]   ;;  %s2502_s2 = inlined_call_operand.hbm [shape: f32[2,16,32], index: 2, kind: input, shape index: {}]   ;;  %s2503_s3 = inlined_call_operand.hbm [shape: bf16[32,32], index: 3, kind: input, shape index: {}]   ;;  %s2504_s4 = inlined_call_operand.hbm [shape: bf16[32,64], index: 4, kind: input, shape index: {}]   ;;  %s2505_s5 = inlined_call_operand.hbm [shape: bf16[32,32], index: 5, kind: input, shape index: {}]   ;;  %s2506_s6 = inlined_call_operand.vmem [shape: f32[6,32], index: 6, kind: input, shape index: {}]   ;;  %s2507_s7 = inlined_call_operand.hbm [shape: f32[2,16,32], index: 7, kind: output, shape index: {}]  }
   0x1   :  { %2525 = sst [smem:[#allocation30_spill]] %s2500_s0 }
   0x2   :  { %2526 = sst [smem:[#allocation31_spill]] %s2501_s1 }
   0x3   :  { %2527 = sst [smem:[#allocation32_spill]] %s2503_s3 }
   0x4   :  { %2528 = sst [smem:[#allocation33_spill]] %s2504_s4 }
   0x5   :  { %2529 = sst [smem:[#allocation34_spill]] %s2505_s5 }
   0x6   :  { %2530 = sst [smem:[#allocation35_spill]] %s2506_s6 }
   0x7   :  { %2531 = sst [smem:[#allocation36_spill]] %s2507_s7 }
   0x8   :  { %12 = vsyncpa [#allocation6], 0 }
   0x9   :  { %14 = vsyncpa [#allocation6 + $0x1], 0 }
   0xa   :  { %15 = vsyncpa [#allocation9], 0 }
   0xb   :  { %17 = vsyncpa [#allocation9 + $0x1], 0 }
   0xc   :  { %18 = vsyncpa [#allocation12], 0 }
   0xd   :  { %19 = vsyncpa [#allocation15], 0 }
   0xe   :  { %20 = vsyncpa [#allocation7], 0 }
   0xf   :  { %22 = vsyncpa [#allocation7 + $0x1], 0  ;;  %s2065_s24 = smov 0   ;;  %s2067_s25 = smov 0  }
  0x10   :  { %s2069_s26 = smov 0   ;;  %s2071_s27 = smov 0  }
  0x11   :  { %s2073_s28 = smov 0   ;;  %s2075_s29 = smov 0  }
  0x12   :  { %s2077_s30 = smov 0   ;;  %s2079_s8 = smov 0  }
  0x13   :  { %s2081_s9 = smov 0   ;;  %s2083_s10 = smov 0  }
  0x14   :  { %s2085_s11 = smov 0  }
  0x15 LB: > { %2532 = sst [smem:[#allocation23_spill]] %s1962_s24  ;;  %s2119_s12 = sadd.s32 4294967295, %s2002_s11   ;;  %s2002_s11 = sphi %s2085_s11, %s28_s11   ;;  %s1998_s10 = sphi %s2083_s10, %s2586_s10   ;;  %s1994_s9 = sphi %s2081_s9, %s2585_s9   ;;  %s1990_s8 = sphi %s2079_s8, %s2584_s8   ;;  %s1986_s30 = sphi %s2077_s30, %s2583_s30   ;;  %s1982_s29 = sphi %s2075_s29, %s2582_s29   ;;  %s1978_s28 = sphi %s2073_s28, %s2581_s28   ;;  %s1974_s27 = sphi %s2071_s27, %s2580_s27   ;;  %s1970_s26 = sphi %s2069_s26, %s2579_s26   ;;  %s1966_s25 = sphi %s2067_s25, %s2578_s25   ;;  %s1962_s24 = sphi %s2065_s24, %s2577_s24  }
  0x16   : > { %2533 = sst [smem:[#allocation24_spill]] %s1986_s30  ;;  %p60_p0 = scmp.ne.s32.totalorder %s1978_s28, %s1974_s27 }
  0x17   : > { %2534 = sst [smem:[#allocation25_spill]] %s1990_s8  ;;  %p2515_p1 = scmp.eq.s32.totalorder %s2119_s12, 0 }
  0x18   : > { %p1356_p3 = scmp.ge.s32.totalorder %s2002_s11, 1  ;;  %p237_p4 = scmp.lt.s32.totalorder %s2002_s11, 5 }
  0x19   : > { %p2128_p5 = por %p2515_p1, %p60_p0  ;;  %s2004_s15 = smov [#allocation11]  }
  0x1a   : > { %p2132_p6 = pnand %p1356_p3, %p237_p4  ;;  %s249_s16 = sshll.u32 %s2004_s15, 4  ;;  %s250_s16 = int_to_ptr.vmem [resolvable:$true] %s249_s16 }
  0x1b   : > { %s1715_s18 = scalar_lea.vmem %s250_s16, 256  ;;  %p1723_p13 = scmp.lt.s32.totalorder %s250_s16, %s250_s16 }
  0x1c   : > { %p1540_p7 = pneg %p2132_p6  ;;  %p1716_p10 = scmp.ne.s32.totalorder %s250_s16, %s1715_s18 }
  0x1d   : > { %p1724_p0 = scmp.lt.s32.totalorder %s1715_s18, %s1715_s18 }
  0x1e   : > { %p2140_p8 = pnand %p1540_p7, %p2515_p1 }
  0x1f   : > { %p1725_p3 = por %p1724_p0, %p1723_p13 }
  0x20   : > { %p1706_p9 = pneg %p2140_p8 }
  0x22   : > { %p1718_p11 = pnand %p1716_p10, %p1706_p9 }
  0x24   : > { %p1719_p12 = pneg %p1718_p11 }
  0x26   : > { %p1726_p4 = pnand %p1725_p3, %p1719_p12 }
  0x28   : > { %1729 = shalt.err (!%p1726_p4)
}
  0x29   : > { %s2509_s19 = smov 64   ;;  %s2511_s20 = smov 4  }
  0x2a   : > { %s2538_s3 = sld [smem:[#allocation32_spill]]  ;;  %p54_p7 = scmp.ne.s32.totalorder %s1982_s29, %s1978_s28 }
  0x2b   : > { %p2516_p10 = scmp.eq.s32.totalorder %s2002_s11, 0  ;;  %p2514_p11 = scmp.lt.s32.totalorder %s2002_s11, 4 }
  0x2c   : > { %s2163_s27 = sand.u32 1, %s1982_s29   ;;  %s309_s15 = sand.u32 1, %s2002_s11  }
  0x2d   : > { %p56_p12 = por %p2516_p10, %p54_p7  ;;  %s1362_s18 = sshll.u32 %s2163_s27, 3 }
  0x2e   : > { %s1415_s7 = sshll.u32 %s1998_s10, 7  ;;  %s2540_s1 = sld [smem:[#allocation31_spill]] }
  0x2f   : > { %p2172_p13 = pnand %p2514_p11, %p56_p12  ;;  %s313_s22 = scalar_lea.vmem [#allocation8], %s1362_s18 }
  0x30   : > { %1543 = dma.hbm_to_vmem [thread:$0]  (!%p2140_p8), %s2538_s3, 256, %s250_s16, [#allocation12], %s2509_s19, %s2509_s19, %s2511_s20  }
  0x31   : > { %s320_s23 = sshll.u32 %s313_s22, 4  ;;  %s2179_s19 = scalar_lea.sflag [#allocation9], %s309_s15  ;;  %s321_s23 = int_to_ptr.vmem [resolvable:$true] %s320_s23 }
  0x32   : > { %p2517_p0 = pneg %p2172_p13  ;;  %s1743_s20 = scalar_lea.vmem %s321_s23, 128 }
  0x33   : > { %p1744_p3 = scmp.ne.s32.totalorder %s321_s23, %s1743_s20  ;;  %s2007_s3 = smov [#allocation8]  }
  0x34   : > { %s319_s16 = scalar_lea.hbm %s2540_s1, %s1415_s7  ;;  %s1748_s6 = sshll.u32 %s2007_s3, 4  ;;  %s1749_s6 = int_to_ptr.vmem [resolvable:$false] %s1748_s6 }
  0x35   : > { %p1746_p4 = pnand %p1744_p3, %p2517_p0  ;;  %s1750_s30 = scalar_lea.vmem %s1749_s6, 256 }
  0x36   : > { %p1751_p12 = scmp.lt.s32.totalorder %s321_s23, %s1749_s6  ;;  %p1752_p11 = scmp.lt.s32.totalorder %s1750_s30, %s1743_s20 }
  0x37   : > { %p1747_p7 = pneg %p1746_p4 }
  0x38   : > { %p1753_p1 = por %p1752_p11, %p1751_p12 }
  0x3a   : > { %p1754_p2 = pnand %p1753_p1, %p1747_p7 }
  0x3c   : > { %1757 = shalt.err (!%p1754_p2)
}
  0x3d   : > { %s2541_s7 = smov 4   ;;  %s2542_s15 = smov 64  }
  0x3e   : > { %1556 = dma.hbm_to_vmem [thread:$0]  (!%p2172_p13), %s319_s16, 128, %s321_s23, %s2179_s19, %s2542_s15, %s2542_s15, %s2541_s7  }
  0x3f   : > { %s2008_s18 = smov [#allocation13]   ;;  %s2009_s22 = smov [#allocation14]  }
  0x40   : > { %s262_s21 = sshll.u32 %s2008_s18, 4  ;;  %s275_s1 = sshll.u32 %s2009_s22, 4  ;;  %s263_s21 = int_to_ptr.vmem [resolvable:$true] %s262_s21  ;;  %s276_s1 = int_to_ptr.vmem [resolvable:$true] %s275_s1 }
  0x41   : > { %s1769_s3 = scalar_lea.vmem %s263_s21, 256  ;;  %p1777_p11 = scmp.lt.s32.totalorder %s263_s21, %s263_s21 }
  0x42   : > { %p1770_p3 = scmp.ne.s32.totalorder %s263_s21, %s1769_s3  ;;  %p1778_p4 = scmp.lt.s32.totalorder %s1769_s3, %s1769_s3 }
  0x44   : > { %p1772_p1 = pnand %p1770_p3, %p1706_p9  ;;  %p1779_p7 = por %p1778_p4, %p1777_p11 }
  0x46   : > { %p1773_p2 = pneg %p1772_p1 }
  0x48   : > { %p1780_p12 = pnand %p1779_p7, %p1773_p2 }
  0x4a   : > { %1783 = shalt.err (!%p1780_p12)
}
  0x4b   : > { %s2543_s4 = sld [smem:[#allocation33_spill]]  ;;  %s1795_s23 = scalar_lea.vmem %s276_s1, 256 }
  0x4c   : > { %p1796_p10 = scmp.ne.s32.totalorder %s276_s1, %s1795_s23  ;;  %p1803_p0 = scmp.lt.s32.totalorder %s276_s1, %s276_s1 }
  0x4d   : > { %p1804_p11 = scmp.lt.s32.totalorder %s1795_s23, %s1795_s23 }
  0x4e   : > { %p1798_p3 = pnand %p1796_p10, %p1706_p9 }
  0x4f   : > { %p1805_p2 = por %p1804_p11, %p1803_p0 }
  0x50   : > { %p1799_p1 = pneg %p1798_p3 }
  0x51   : > { %1546 = dma.hbm_to_vmem [thread:$0]  (!%p2140_p8), %s2543_s4, 256, %s263_s21, [#allocation12], %s2542_s15, %s2542_s15, %s2541_s7  }
  0x52   : > { %p1806_p4 = pnand %p1805_p2, %p1799_p1 }
  0x54   : > { %1809 = shalt.err (!%p1806_p4)
}
  0x55   : > { %s2544_s5 = sld [smem:[#allocation34_spill]]  ;;  %s1361_s18 = sshll.u32 %s1998_s10, 4 }
  0x56   : > { %s295_s21 = scalar_lea.vmem [#allocation5], %s2163_s27  ;;  %s2545_s0 = sld [smem:[#allocation30_spill]] }
  0x57   : > { %s302_s22 = sshll.u32 %s295_s21, 4  ;;  %s293_s17 = scalar_lea.sflag [#allocation6], %s2163_s27  ;;  %s303_s22 = int_to_ptr.vmem [resolvable:$true] %s302_s22 }
  0x58   : > { %s1823_s23 = scalar_lea.vmem %s303_s22, 16  ;;  %p2546_p10 = pneg %p2172_p13 }
  0x59   : > { %p1824_p9 = scmp.ne.s32.totalorder %s303_s22, %s1823_s23  ;;  %s2010_s16 = smov [#allocation5]  }
  0x5a   : > { %s1828_s30 = sshll.u32 %s2010_s16, 4  ;;  %s1829_s30 = int_to_ptr.vmem [resolvable:$false] %s1828_s30 }
  0x5b   : > { %1549 = dma.hbm_to_vmem [thread:$0]  (!%p2140_p8), %s2544_s5, 256, %s276_s1, [#allocation15], %s2542_s15, %s2542_s15, %s2541_s7  }
  0x5c   : > { %s300_s20 = scalar_lea.hbm %s2545_s0, %s1361_s18  ;;  %p1826_p0 = pnand %p1824_p9, %p2546_p10 }
  0x5d   : > { %s1830_s4 = scalar_lea.vmem %s1829_s30, 32  ;;  %p1831_p8 = scmp.lt.s32.totalorder %s303_s22, %s1829_s30 }
  0x5e   : > { %p1827_p7 = pneg %p1826_p0  ;;  %p1832_p12 = scmp.lt.s32.totalorder %s1830_s4, %s1823_s23 }
  0x60   : > { %p1833_p3 = por %p1832_p12, %p1831_p8 }
  0x62   : > { %p1834_p1 = pnand %p1833_p3, %p1827_p7 }
  0x64   : > { %1837 = shalt.err (!%p1834_p1)
}
  0x65   : > { %1553 = dma.hbm_to_vmem [thread:$0]  (!%p2172_p13), %s300_s20, 16, %s303_s22, %s293_s17  }
  0x66   : > { %s1355_s1 = sadd.s32 4294967294, %s2002_s11   ;;  %s37_s4 = sadd.s32 1, %s1994_s9 }
  0x67   : > { %p38_p11 = scmp.ge.s32.totalorder %s37_s4, 2  ;;  %s40_s8 = sadd.s32 1, %s1998_s10 }
  0x68   : > { %s101_s27 = sadd.s32 1, %s1970_s26  ;;  %p108_p2 = scmp.ne.s32.totalorder %s1970_s26, %s1966_s25 }
  0x69   : > { %s2588_s4 = smov (%p38_p11, %s37_s4), 0  ;;  %s2590_s8 = smov (!%p38_p11, %s40_s8), %s1998_s10 }
  0x6a   : > { %2547 = sst [smem:[#allocation26_spill]] %s2588_s4  ;;  %s97_s7 = ssub.s32 %s1994_s9, %s2588_s4 }
  0x6b   : > { %p2548_p4 = scmp.eq.s32.totalorder %s2002_s11, 0  ;;  %p42_p13 = scmp.ge.s32.totalorder %s2590_s8, 2 }
  0x6c   : > { %p114_p10 = scmp.ne.s32.totalorder %s1966_s25, %s1962_s24  ;;  %p2550_p0 = scmp.eq.s32.totalorder %s2119_s12, 3 }
  0x6d   : > { %p2238_p9 = por %p108_p2, %p2548_p4  ;;  %p230_p8 = scmp.eq.s32.totalorder %s1355_s1, 3 }
  0x6e   : > { %p2246_p7 = por %p2550_p0, %p108_p2  ;;  %s2592_s8 = smov (%p42_p13, %s2590_s8), 0 }
  0x6f   : > { %2553 = sst [smem:[#allocation28_spill]] %s2592_s8  ;;  %p2554_p12 = scmp.eq.s32.totalorder %s2119_s12, 0 }
  0x70   : > { %s2551_s18 = scalar_select %p2246_p7, 1, 0 }
  0x71   : > { %p2254_p3 = por %p114_p10, %p2554_p12  ;;  %p2258_p1 = por %p230_p8, %p114_p10 }
  0x72   : > { %2552 = sst [smem:[#allocation27_spill]] %s2551_s18  ;;  %s44_s3 = ssub.s32 %s1998_s10, %s2592_s8 }
  0x73   : > { %s2556_s22 = scalar_select %p2258_p1, 1, 0 }
  0x74   : > { %s332_s6 = sand.u32 1, %s1970_s26   ;;  %p45_p11 = scmp.eq.s32.totalorder %s44_s3, 0 }
  0x75   : > { %2557 = sst [smem:[#allocation29_spill]] %s2556_s22  ;;  %s98_s20 = sor.u32 %s97_s7, %s44_s3 }
  0x76   : > { %p99_p2 = scmp.eq.s32.totalorder %s98_s20, 0  ;;  %s1365_s17 = sshll.u32 %s332_s6, 3 }
  0x77   : > { %s2558_s23 = sadd.s32 1, %s1982_s29  ;;  %s1366_s1 = sshll.u32 %s1998_s10, 1 }
  0x78   : > { %s2268_s16 = scalar_select %p45_p11, %s1982_s29, %s2558_s23  }
  0x79   : > { %s2271_s30 = scalar_select %p99_p2, %s1970_s26, %s101_s27  }
  0x7a   : > { %s339_s0 = sadd.s32 %s1994_s9, %s1366_s1  ;;  %s334_s5 = scalar_lea.vmem [#allocation10], %s1365_s17 }
  0x7b   : > { %s343_s4 = sshll.u32 %s334_s5, 4  ;;  %s1367_s24 = sshll.u32 %s339_s0, 7  ;;  %s344_s4 = int_to_ptr.vmem [resolvable:$true] %s343_s4 }
  0x7c   : > { %s341_s8 = scalar_lea.hbm %s2502_s2, %s1367_s24  ;;  %p2559_p4 = scmp.lt.s32.totalorder %s2002_s11, 4 }
  0x7d   : > { %s1851_s27 = scalar_lea.vmem %s344_s4, 128  ;;  %s2011_s5 = smov [#allocation10]  }
  0x7e   : > { %p2282_p13 = pnand %p2559_p4, %p2238_p9  ;;  %p1852_p0 = scmp.ne.s32.totalorder %s344_s4, %s1851_s27 }
  0x7f   : > { %s1856_s0 = sshll.u32 %s2011_s5, 4  ;;  %s1857_s0 = int_to_ptr.vmem [resolvable:$false] %s1856_s0 }
  0x80   : > { %p1840_p10 = pneg %p2282_p13  ;;  %s1858_s3 = scalar_lea.vmem %s1857_s0, 256 }
  0x81   : > { %p1859_p11 = scmp.lt.s32.totalorder %s344_s4, %s1857_s0  ;;  %p1860_p2 = scmp.lt.s32.totalorder %s1858_s3, %s1851_s27 }
  0x82   : > { %p1854_p8 = pnand %p1852_p0, %p1840_p10 }
  0x83   : > { %p1861_p1 = por %p1860_p2, %p1859_p11 }
  0x84   : > { %p1855_p12 = pneg %p1854_p8 }
  0x86   : > { %p1862_p7 = pnand %p1861_p1, %p1855_p12 }
  0x88   : > { %1865 = shalt.err (!%p1862_p7)
}
  0x89   : > { %1559 = dma.hbm_to_vmem [thread:$0]  (!%p2282_p13), %s341_s8, 128, %s344_s4, %s2179_s19  }
  0x8a   : > { %352 = sbr.rel (%p2132_p6) target bundleno = 2180 (0x884), region = 48  ;;  %s2294_s24 = sand.u32 (!%p2132_p6), 1, %s1978_s28  }
  0x8b   : > { %s355_s15 = scalar_lea.sflag (!%p2132_p6), [#allocation6], %s2294_s24  ;;  %s357_s18 = scalar_lea.vmem (!%p2132_p6), [#allocation5], %s2294_s24 }
  0x8f   : > { %1937 = dma.done.wait (%p2128_p5), %s355_s15, 16  }
  0x90   : > { %1939 = vsyncadd (%p2128_p5), %s355_s15, 4294967280  ;;  %s362_s19 = sand.u32 1, %s2119_s12   ;;  %s1369_s4 = sshll.u32 %s2294_s24, 3 }
  0x91   : > { %s363_s14 = scalar_lea.sflag [#allocation9], %s362_s19  ;;  %s2304_s8 = scalar_lea.vmem [#allocation8], %s1369_s4 }
  0x92   : > { %1941 = dma.done.wait (%p2128_p5), %s363_s14, 128  }
  0x93   : > { %1943 = vsyncadd (%p2128_p5), %s363_s14, 4294967168  ;;  %s373_s22 = sand.u32 1, %s1966_s25  }
  0x94   : > { %s2313_s6 = sshll.u32 %s373_s22, 3 }
  0x95   : > { %s375_s20 = scalar_lea.vmem [#allocation10], %s2313_s6 }
  0x96   : > { %1945 = dma.done.wait (%p2254_p3), %s363_s14, 128  }
  0x97   : > { %1947 = vsyncadd (%p2254_p3), %s363_s14, 4294967168  ;;  %p2561_p6 = scmp.eq.s32.totalorder %s2119_s12, 0 }
  0x99   : > { %1949 = dma.done.wait (%p2561_p6), [#allocation12], 512   ;;  %p2562_p9 = pmov %p2561_p6 }
  0x9a   : > { %p2563_p5 = pmov %p2561_p6 }
  0x9b   : > { %1951 = vsyncadd (%p2562_p9), [#allocation12], 4294966784 }
  0x9c   : > { %1953 = dma.done.wait (%p2563_p5), [#allocation15], 256   ;;  %p2564_p7 = pmov %p2563_p5 }
  0x9d   : > { %s2565_s23 = sld [smem:[#allocation35_spill]]  ;;  %s426_s4 = scalar_lea.vmem [#allocation16], %s2313_s6 }
  0x9e   : > { %1955 = vsyncadd (%p2564_p7), [#allocation15], 4294967040  ;;  %s2566_s14 = sld [smem:[#allocation24_spill]] }
  0xa3   : > { %v2331_v0 = vld [vmem:[%s2565_s23] ss:$0 sm:$0xff]  ;;  %v1380_v1 = vld [vmem:[%s2565_s23 + $0x1] ss:$0 sm:$0xff]  ;;  %v1383_v2 = vld [vmem:[%s2565_s23 + $0x2] ss:$0 sm:$0xff] }
  0xa4   : > { %v2342_v3 = vld [vmem:[%s2565_s23 + $0x3] ss:$0 sm:$0xff]  ;;  %v2347_v4 = vld [vmem:[%s2565_s23 + $0x4] ss:$0 sm:$0xff]  ;;  %v2352_v5 = vld [vmem:[%s2565_s23 + $0x5] ss:$0 sm:$0xff] }
  0xa5   : > { %p1375_p3 = scmp.ne.s32.totalorder %s2566_s14, 0 }
  0xa6   : > { %s2014_s13 = smov (!%p1375_p3), 32   ;;  %s2015_s17 = smov (!%p1375_p3), 96  }
  0xa7   : > { %437 = sbr.rel (%p1375_p3) target bundleno = 498 (0x1f2), region = 76 }
  0xac   : > { %v1677_v6 = vld [vmem:[#allocation13 + $0x8] sm:$0xff]   ;;  %v2012_v7 = vmov 0.0   ;;  %v1678_v8 = vld [vmem:[#allocation13] sm:$0xff]   ;;  %vm2013_vm0 = vmmov 0   ;;  %528 = vrot.lane.b32.xlu0 %v1383_v2, %s2014_s13  ;;  %v1679_v9 = vld [vmem:[%s2304_s8] sm:$0xff]   ;;  %vm461_vm1 = vcmask 261120  }
  0xad   : > { %1448 = vmatprep.subr.bf16.mxu0 %v2012_v7  ;;  %1452 = vmatprep.mubr.msk.bf16.mxu0 %vm2013_vm0, %v2012_v7  ;;  %vm520_vm2 = vcmask 257024  }
  0xae   : > { %1449 = vmatpush3.bf16.msra.mxu0 %v1677_v6 }
  0xaf   : > { %1450 = vmatprep.subr.bf16.mxu0 %v2012_v7 }
  0xb2   : > { %1451 = vmatpush3.bf16.msra.mxu0 %v1678_v8 }
  0xb5   : > { %1453 = vmatmul.mubr.msk.bf16.vlgmr.msra.gmra.mxu0 %vm461_vm1, %v1679_v9 }
 0x11e   : > { %v529_v10 = vpop.permute.xlu0 %528 }
 0x175   : > { %v499_v11 = vpop.f32.mrf.mxu0 }
 0x176   : > { %v510_v12 = vadd.f32 %v1380_v1, %v499_v11  ;;  %v531_v13 = vadd.f32 %v529_v10, %v499_v11 }
 0x177   : > { %v1454_v14 = vpop.f32.mrf.mxu0 }
 0x178   : > { %v1416_v15 = vpack.c.bf16 %v510_v12, %v510_v12  ;;  %v1418_v16 = vpack.c.bf16 %v531_v13, %v531_v13 }
 0x179   : > { %v502_v17 = vpop.f32.mrf.mxu0 }
 0x17a   : > { %521 = vst.msk [vmem:[#allocation2] sm:$0xf] %vm520_vm2, %v1416_v15  ;;  %v511_v18 = vadd.f32 %v1380_v1, %v502_v17  ;;  %v532_v19 = vadd.f32 %v529_v10, %v502_v17  ;;  %539 = vrot.lane.b32.xlu0 %v1418_v16, %s2015_s17 }
 0x17b   : > { %v1455_v20 = vpop.f32.mrf.mxu0 }
 0x17c   : > { %v1417_v21 = vpack.c.bf16 %v511_v18, %v511_v18  ;;  %v1419_v22 = vpack.c.bf16 %v532_v19, %v532_v19 }
 0x17e   : > { %522 = vst.msk [vmem:[#allocation2 + $0x4] sm:$0xf] %vm520_vm2, %v1417_v21  ;;  %541 = vrot.lane.b32.xlu1 %v1419_v22, %s2015_s17 }
 0x1ec   : > { %v540_v23 = vpop.permute.xlu0 %539 }
 0x1ed   : > { %545 = vst.msk [vmem:[#allocation3] sm:$0xf] %vm520_vm2, %v540_v23 }
 0x1f0   : > { %v542_v24 = vpop.permute.xlu1 %541 }
 0x1f1   : > { %546 = vst.msk [vmem:[#allocation3 + $0x4] sm:$0xf] %vm520_vm2, %v542_v24 }
 0x1f2 PF: > { %v1680_v25 = vld [vmem:[#allocation11 + $0x8] sm:$0xff]   ;;  %v2016_v26 = vmov 0.0   ;;  %v1681_v27 = vld [vmem:[#allocation11] sm:$0xff]   ;;  %vm2017_vm3 = vmmov 0   ;;  %v2367_v28 = vld [vmem:[%s375_s20] sm:$0xff]  ;;  %vm630_vm4 = vcmask 64512  }
 0x1f3   : > { %1456 = vmatprep.subr.bf16.mxu0 %v2016_v26  ;;  %1464 = vmatprep.subr.bf16.mxu1 %v2016_v26  ;;  %v1682_v29 = vld [vmem:[#allocation2] sm:$0xff]   ;;  %v548_v30 = vpack.c.bf16 %v2367_v28, %v2367_v28  ;;  %s2018_s8 = smov 120   ;;  %vm569_vm5 = vcmask 261120   ;;  %s2019_s20 = smov 112   ;;  %v1390_v47 = vld [vmem:[%s357_s18] ss:$0 sm:$0xff] }
 0x1f4   : > { %1457 = vmatpush3.bf16.msra.mxu0 %v1680_v25  ;;  %1460 = vmatprep.mubr.msk.bf16.mxu0 %vm2017_vm3, %v2016_v26  ;;  %v635_v31 = vsel %vm630_vm4, %v1682_v29, 0  ;;  %s2020_s21 = smov 104   ;;  %vm677_vm6 = vcmask 130048   ;;  %vm740_vm7 = vcmask 60416   ;;  %s2021_s24 = smov 8   ;;  %vm858_vm8 = vcmask 126016  }
 0x1f5   : > { %1458 = vmatprep.subr.bf16.mxu0 %v2016_v26  ;;  %1466 = vmatprep.mubr.msk.bf16.mxu1 %vm2017_vm3, %v2016_v26  ;;  %s2022_s18 = smov 16   ;;  %s2023_s1 = smov 24   ;;  %vm975_vm9 = vcmask 191616   ;;  %vm1092_vm10 = vcmask 257216  }
 0x1f6   : > { %745 = vrot.lane.b32.xlu0 %v1682_v29, %s2018_s8  ;;  %1465 = vmatpush3.bf16.xpose.msra.mxu1 %v635_v31  ;;  %s2567_s7 = sld [smem:[#allocation25_spill]]  ;;  %s1200_s15 = sshll.u32 %s426_s4, 4  ;;  %s1201_s15 = int_to_ptr.vmem [resolvable:$true] %s1200_s15 }
 0x1f7   : > { %1476 = vmatprep.subr.bf16.mxu1 %v2016_v26  ;;  %862 = vrot.lane.b32.xlu1 %v1682_v29, %s2019_s20  ;;  %s2568_s27 = sld [smem:[#allocation24_spill]] }
 0x1f8   : > { %1459 = vmatpush3.bf16.msra.mxu0 %v1681_v27  ;;  %v1683_v54 = vld [vmem:[#allocation3] sm:$0xff]   ;;  %s2569_s5 = sld [smem:[#allocation27_spill]] }
 0x1f9   : > { %1470 = vmatprep.subr.bf16.mxu0 %v2016_v26  ;;  %s2570_s13 = sld [smem:[#allocation36_spill]] }
 0x1fb   : > { %1461 = vmatmul.mubr.msk.bf16.vlgmr.msra.gmra.mxu0 %vm569_vm5, %v548_v30 }
 0x1fc   : > { %1472 = vmatprep.mubr.msk.bf16.mxu0 %vm2017_vm3, %v2016_v26  ;;  %1471 = vmatpush3.bf16.msra.mxu0 %v1683_v54  ;;  %s1411_s0 = sshll.u32 %s2567_s7, 1 }
 0x1fd   : > { %1482 = vmatprep.subr.bf16.mxu0 %v2016_v26  ;;  %s1196_s12 = sadd.s32 %s2568_s27, %s1411_s0 }
 0x1fe   : > { %s1412_s3 = sshll.u32 %s1196_s12, 7  ;;  %p2571_p4 = scmp.ne.s32.totalorder %s2569_s5, 0 }
 0x1ff   : > { %s1198_s17 = scalar_lea.hbm %s2570_s13, %s1412_s3 }
 0x268   : > { %v746_v34 = vpop.permute.xlu0 %745 }
 0x269   : > { %v751_v38 = vsel %vm630_vm4, %v746_v34, 0  ;;  %v863_v40 = vpop.permute.xlu1 %862 }
 0x26a   : > { %v868_v41 = vsel %vm630_vm4, %v863_v40, 0 }
 0x2bb   : > { %v607_v32 = vpop.f32.mrf.mxu0 }
 0x2bc   : > { %v608_v33 = vadd.f32 %v2331_v0, %v607_v32 }
 0x2bd   : > { %v1462_v35 = vpop.f32.mrf.mxu0 }
 0x2be   : > { %v613_v36 = vpack.c.bf16 %v608_v33, %v608_v33 }
 0x2bf   : > { %v610_v37 = vpop.f32.mrf.mxu0 }
 0x2c0   : > { %860 = vrot.lane.b32.xlu1 %v613_v36, %s2019_s20  ;;  %743 = vrot.lane.b32.xlu0 %v613_v36, %s2018_s8 }
 0x2c1   : > { %1467 = vmatmul.mubr.msk.bf16.vlgmr.msra.gmra.mxu1 %vm630_vm4, %v613_v36  ;;  %v1463_v39 = vpop.f32.mrf.mxu0 }
 0x2c2   : > { %1477 = vmatpush3.bf16.xpose.msra.mxu1 %v751_v38  ;;  %1478 = vmatprep.mubr.msk.bf16.mxu1 %vm2017_vm3, %v2016_v26 }
 0x2c3   : > { %1488 = vmatprep.subr.bf16.mxu1 %v2016_v26 }
 0x2c4   : > { %977 = vrot.lane.b32.xlu1 %v613_v36, %s2020_s21  ;;  %979 = vrot.lane.b32.xlu0 %v1682_v29, %s2020_s21 }
 0x332   : > { %v744_v42 = vpop.permute.xlu0 %743  ;;  %v861_v45 = vpop.permute.xlu1 %860 }
 0x333   : > { %1479 = vmatmul.mubr.msk.bf16.vlgmr.msra.gmra.mxu1 %vm630_vm4, %v744_v42 }
 0x334   : > { %1489 = vmatpush3.bf16.xpose.msra.mxu1 %v868_v41  ;;  %1490 = vmatprep.mubr.msk.bf16.mxu1 %vm2017_vm3, %v2016_v26 }
 0x335   : > { %1500 = vmatprep.subr.bf16.mxu1 %v2016_v26 }
 0x336   : > { %v980_v43 = vpop.permute.xlu0 %979  ;;  %v978_v46 = vpop.permute.xlu1 %977 }
 0x337   : > { %v985_v44 = vsel %vm630_vm4, %v980_v43, 0 }
 0x33b   : > { %1491 = vmatmul.mubr.msk.bf16.vlgmr.msra.gmra.mxu1 %vm630_vm4, %v861_v45 }
 0x33c   : > { %1501 = vmatpush3.bf16.xpose.msra.mxu1 %v985_v44  ;;  %1502 = vmatprep.mubr.msk.bf16.mxu1 %vm2017_vm3, %v2016_v26 }
 0x33d   : > { %1512 = vmatprep.subr.bf16.mxu1 %v2016_v26 }
 0x343   : > { %1503 = vmatmul.mubr.msk.bf16.vlgmr.msra.gmra.mxu1 %vm630_vm4, %v978_v46 }
 0x344   : > { %1516 = vmatprep.mubr.msk.bf16.mxu1 %vm2017_vm3, %v2016_v26 }
 0x381   : > { %v671_v48 = vpop.f32.mrf.mxu1 }
 0x382   : > { %v672_v49 = vadd.f32 %v1390_v47, %v671_v48 }
 0x383   : > { %v1468_v50 = vpop.f32.mrf.mxu1 }
 0x384   : > { %v678_v51 = vsel %vm677_vm6, %v672_v49, -inf }
 0x385   : > { %679 = vmax.xlane.f32.xlu0 %v678_v51  ;;  %v674_v52 = vpop.f32.mrf.mxu1 }
 0x387   : > { %v1469_v53 = vpop.f32.mrf.mxu1 }
 0x3f3   : > { %v787_v55 = vpop.f32.mrf.mxu1 }
 0x3f4   : > { %v788_v56 = vadd.f32 %v1390_v47, %v787_v55 }
 0x3f5   : > { %v1480_v57 = vpop.f32.mrf.mxu1 }
 0x3f6   : > { %v793_v58 = vsel %vm677_vm6, %v788_v56, -inf }
 0x3f7   : > { %794 = vmax.xlane.f32.xlu1 %v793_v58  ;;  %v790_v59 = vpop.f32.mrf.mxu1 }
 0x3f9   : > { %v1481_v60 = vpop.f32.mrf.mxu1 }
 0x3fb   : > { %v904_v61 = vpop.f32.mrf.mxu1 }
 0x3fc   : > { %v905_v62 = vadd.f32 %v1390_v47, %v904_v61 }
 0x3fd   : > { %v1492_v63 = vpop.f32.mrf.mxu1 }
 0x3fe   : > { %v910_v0 = vsel %vm677_vm6, %v905_v62, -inf  ;;  %v1684_v63 = vld [vmem:[#allocation14 + $0x8] sm:$0xff]  }
 0x3ff   : > { %911 = vmax.xlane.f32.xlu0 %v910_v0  ;;  %v907_v1 = vpop.f32.mrf.mxu1  ;;  %1513 = vmatpush3.bf16.msra.mxu1 %v1684_v63 }
 0x400   : > { %v1685_v1 = vld [vmem:[#allocation14] sm:$0xff]   ;;  %1514 = vmatprep.subr.bf16.mxu1 %v2016_v26 }
 0x401   : > { %v1493_v2 = vpop.f32.mrf.mxu1 }
 0x403   : > { %v1021_v6 = vpop.f32.mrf.mxu1  ;;  %1515 = vmatpush3.bf16.msra.mxu1 %v1685_v1 }
 0x404   : > { %v1022_v7 = vadd.f32 %v1390_v47, %v1021_v6 }
 0x405   : > { %v1504_v8 = vpop.f32.mrf.mxu1 }
 0x406   : > { %v1027_v9 = vsel %vm677_vm6, %v1022_v7, -inf }
 0x407   : > { %1028 = vmax.xlane.f32.xlu0 %v1027_v9  ;;  %v1024_v10 = vpop.f32.mrf.mxu1 }
 0x409   : > { %v1505_v11 = vpop.f32.mrf.mxu1 }
 0x40e   : > { %v680_v12 = vpop.xlane.xlu0 %679 }
 0x40f   : > { %v681_v13 = vsub.f32 %v672_v49, %v680_v12 }
 0x411   : > { %v682_v14 = vmul.f32 1.442695, %v681_v13 }
 0x413   : > { %1686 = vpow2.f32 %v682_v14 }
 0x420   : > { %v1687_v15 = vpop.eup %1686 }
 0x421   : > { %v684_v16 = vsel %vm677_vm6, %v1687_v15, 0.0 }
 0x422   : > { %685 = vadd.xlane.f32.xlu1 %v684_v16 }
 0x433   : > { %805 = vrot.lane.b32.xlu1 %v1683_v54, %s2018_s8  ;;  %s1185_s8 = scalar_lea.sflag [#allocation7], %s373_s22 }
 0x480   : > { %v795_v17 = vpop.xlane.xlu1 %794 }
 0x481   : > { %v796_v18 = vsub.f32 %v788_v56, %v795_v17 }
 0x483   : > { %v797_v19 = vmul.f32 1.442695, %v796_v18 }
 0x485   : > { %1688 = vpow2.f32 %v797_v19 }
 0x488   : > { %v912_v20 = vpop.xlane.xlu0 %911 }
 0x489   : > { %v913_v21 = vsub.f32 %v905_v62, %v912_v20 }
 0x48b   : > { %v914_v22 = vmul.f32 1.442695, %v913_v21 }
 0x48d   : > { %1690 = vpow2.f32 %v914_v22 }
 0x490   : > { %v1029_v23 = vpop.xlane.xlu0 %1028 }
 0x491   : > { %v1030_v24 = vsub.f32 %v1022_v7, %v1029_v23 }
 0x492   : > { %v1689_v25 = vpop.eup %1688 }
 0x493   : > { %v1031_v27 = vmul.f32 1.442695, %v1030_v24  ;;  %v799_v29 = vsel %vm677_vm6, %v1689_v25, 0.0 }
 0x494   : > { %800 = vadd.xlane.f32.xlu0 %v799_v29 }
 0x495   : > { %1692 = vpow2.f32 %v1031_v27 }
 0x49a   : > { %v1691_v30 = vpop.eup %1690 }
 0x49b   : > { %v916_v31 = vsel %vm677_vm6, %v1691_v30, 0.0 }
 0x49c   : > { %917 = vadd.xlane.f32.xlu1 %v916_v31 }
 0x4a2   : > { %v1693_v32 = vpop.eup %1692 }
 0x4a3   : > { %v1033_v33 = vsel %vm677_vm6, %v1693_v32, 0.0 }
 0x4a4   : > { %1034 = vadd.xlane.f32.xlu0 %v1033_v33 }
 0x4ab   : > { %v686_v34 = vpop.xlane.xlu1 %685 }
 0x4ac   : > { %1694 = vrcp.f32 %v686_v34 }
 0x4ad   : > { %1039 = vrot.lane.b32.xlu1 %v1683_v54, %s2020_s21  ;;  %s2024_s21 = smov [#allocation16]  }
 0x4af   : > { %v806_v38 = vpop.permute.xlu1 %805 }
 0x4b9   : > { %v1695_v35 = vpop.eup %1694 }
 0x4ba   : > { %v688_v36 = vmul.f32 %v1695_v35, %v1687_v15  ;;  %922 = vrot.lane.b32.xlu0 %v1683_v54, %s2019_s20  ;;  %s1866_s20 = scalar_lea.vmem %s1201_s15, 128 }
 0x4bb   : > { %p1867_p1 = scmp.ne.s32.totalorder %s1201_s15, %s1866_s20 }
 0x4bc   : > { %v689_v37 = vpack.c.bf16 %v688_v36, %v688_v36 }
 0x4bd   : > { %p1868_p13 = pnand %p1867_p1, %p2571_p4 }
 0x4be   : > { %1473 = vmatmul.mubr.msk.bf16.vlgmr.msra.gmra.mxu0 %vm677_vm6, %v689_v37 }
 0x4bf   : > { %1483 = vmatpush3.bf16.msra.mxu0 %v806_v38  ;;  %1484 = vmatprep.mubr.msk.bf16.mxu0 %vm2017_vm3, %v2016_v26  ;;  %p1869_p10 = pneg %p1868_p13 }
 0x4c0   : > { %1494 = vmatprep.subr.bf16.mxu0 %v2016_v26 }
 0x51d   : > { %v801_v39 = vpop.xlane.xlu0 %800 }
 0x51e   : > { %1696 = vrcp.f32 %v801_v39 }
 0x525   : > { %v918_v40 = vpop.xlane.xlu1 %917 }
 0x526   : > { %1698 = vrcp.f32 %v918_v40 }
 0x529   : > { %v1040_v49 = vpop.permute.xlu1 %1039 }
 0x52b   : > { %v1697_v41 = vpop.eup %1696 }
 0x52c   : > { %v803_v42 = vmul.f32 %v1697_v41, %v1689_v25 }
 0x52d   : > { %v1035_v43 = vpop.xlane.xlu0 %1034 }
 0x52e   : > { %1700 = vrcp.f32 %v1035_v43  ;;  %v804_v44 = vpack.c.bf16 %v803_v42, %v803_v42 }
 0x530   : > { %1485 = vmatmul.mubr.msk.bf16.vlgmr.msra.gmra.mxu0 %vm677_vm6, %v804_v44 }
 0x531   : > { %v923_v45 = vpop.permute.xlu0 %922  ;;  %1496 = vmatprep.mubr.msk.bf16.mxu0 %vm2017_vm3, %v2016_v26 }
 0x532   : > { %1495 = vmatpush3.bf16.msra.mxu0 %v923_v45 }
 0x533   : > { %v1699_v46 = vpop.eup %1698  ;;  %1506 = vmatprep.subr.bf16.mxu0 %v2016_v26 }
 0x534   : > { %v920_v47 = vmul.f32 %v1699_v46, %v1691_v30 }
 0x536   : > { %v921_v48 = vpack.c.bf16 %v920_v47, %v920_v47 }
 0x538   : > { %1497 = vmatmul.mubr.msk.bf16.vlgmr.msra.gmra.mxu0 %vm677_vm6, %v921_v48 }
 0x539   : > { %1507 = vmatpush3.bf16.msra.mxu0 %v1040_v49  ;;  %1508 = vmatprep.mubr.msk.bf16.mxu0 %vm2017_vm3, %v2016_v26 }
 0x53b   : > { %v1701_v50 = vpop.eup %1700 }
 0x53c   : > { %v1037_v51 = vmul.f32 %v1701_v50, %v1693_v32 }
 0x53e   : > { %v1038_v52 = vpack.c.bf16 %v1037_v51, %v1037_v51 }
 0x540   : > { %1509 = vmatmul.mubr.msk.bf16.vlgmr.msra.gmra.mxu0 %vm677_vm6, %v1038_v52 }
 0x57e   : > { %v733_v53 = vpop.f32.mrf.mxu0 }
 0x57f   : > { %v739_v54 = vpack.c.bf16 %v733_v53, %v733_v53 }
 0x580   : > { %v1474_v55 = vpop.f32.mrf.mxu0 }
 0x581   : > { %741 = vst.msk [vmem:[#allocation4] sm:$0xf] %vm740_vm7, %v739_v54 }
 0x582   : > { %v736_v56 = vpop.f32.mrf.mxu0 }
 0x584   : > { %v1475_v57 = vpop.f32.mrf.mxu0 }
 0x5f0   : > { %v845_v58 = vpop.f32.mrf.mxu0 }
 0x5f1   : > { %v1420_v59 = vpack.c.bf16 %v845_v58, %v845_v58 }
 0x5f2   : > { %v1486_v60 = vpop.f32.mrf.mxu0 }
 0x5f3   : > { %855 = vrot.lane.b32.xlu1 %v1420_v59, %s2021_s24  ;;  %s1870_s24 = sshll.u32 %s2024_s21, 4  ;;  %s1871_s24 = int_to_ptr.vmem [resolvable:$false] %s1870_s24 }
 0x5f4   : > { %v848_v61 = vpop.f32.mrf.mxu0  ;;  %p1873_p0 = scmp.lt.s32.totalorder %s1201_s15, %s1871_s24 }
 0x5f6   : > { %v1487_v62 = vpop.f32.mrf.mxu0 }
 0x5f8   : > { %v962_v0 = vpop.f32.mrf.mxu0 }
 0x5f9   : > { %v1421_v2 = vpack.c.bf16 %v962_v0, %v962_v0 }
 0x5fa   : > { %v1498_v6 = vpop.f32.mrf.mxu0 }
 0x5fb   : > { %972 = vrot.lane.b32.xlu0 %v1421_v2, %s2022_s18  ;;  %s1872_s18 = scalar_lea.vmem %s1871_s24, 256 }
 0x5fc   : > { %v965_v7 = vpop.f32.mrf.mxu0  ;;  %p1874_p8 = scmp.lt.s32.totalorder %s1872_s18, %s1866_s20 }
 0x5fe   : > { %v1499_v8 = vpop.f32.mrf.mxu0  ;;  %p1875_p12 = por %p1874_p8, %p1873_p0 }
 0x600   : > { %v1079_v9 = vpop.f32.mrf.mxu0  ;;  %p1876_p11 = pnand %p1875_p12, %p1869_p10 }
 0x601   : > { %v1422_v10 = vpack.c.bf16 %v1079_v9, %v1079_v9 }
 0x602   : > { %v1510_v11 = vpop.f32.mrf.mxu0 }
 0x603   : > { %1089 = vrot.lane.b32.xlu1 %v1422_v10, %s2023_s1 }
 0x604   : > { %v1082_v12 = vpop.f32.mrf.mxu0 }
 0x606   : > { %v1511_v13 = vpop.f32.mrf.mxu0 }
 0x665   : > { %v856_v14 = vpop.permute.xlu1 %855 }
 0x666   : > { %859 = vst.msk [vmem:[#allocation4] sm:$0xf] %vm858_vm8, %v856_v14 }
 0x66d   : > { %v973_v15 = vpop.permute.xlu0 %972 }
 0x66e   : > { %976 = vst.msk [vmem:[#allocation4] sm:$0xf] %vm975_vm9, %v973_v15 }
 0x675   : > { %v1090_v26 = vpop.permute.xlu1 %1089 }
 0x676   : > { %1093 = vst.msk [vmem:[#allocation4] sm:$0xf] %vm1092_vm10, %v1090_v26 }
 0x67d   : > { %v1094_v16 = vld [vmem:[#allocation4] sm:$0xf] }
 0x67e   : > { %1517 = vmatmul.mubr.msk.bf16.vlgmr.msra.gmra.mxu1 %vm569_vm5, %v1094_v16 }
 0x73e   : > { %v1152_v17 = vpop.f32.mrf.mxu1 }
 0x73f   : > { %v1153_v18 = vadd.f32 %v2342_v3, %v1152_v17 }
 0x740   : > { %v1518_v19 = vpop.f32.mrf.mxu1 }
 0x741   : > { %v1158_v20 = vadd.f32 %v1153_v18, %v2367_v28 }
 0x742   : > { %v1155_v21 = vpop.f32.mrf.mxu1 }
 0x743   : > { %v1159_v22 = vsel %vm569_vm5, %v1158_v20, 0.0 }
 0x744   : > { %1160 = vadd.xlane.f32.xlu0 %v1159_v22  ;;  %v1519_v23 = vpop.f32.mrf.mxu1 }
 0x7cd   : > { %v1161_v24 = vpop.xlane.xlu0 %1160 }
 0x7ce   : > { %v1163_v25 = vmul.f32 0.03125, %v1161_v24 }
 0x7d0   : > { %v1164_v27 = vsub.f32 %v1158_v20, %v1163_v25 }
 0x7d2   : > { %v1165_v29 = vmul.f32 %v1164_v27, %v1164_v27 }
 0x7d4   : > { %v1166_v30 = vsel %vm569_vm5, %v1165_v29, 0.0 }
 0x7d5   : > { %1167 = vadd.xlane.f32.xlu1 %v1166_v30 }
 0x85e   : > { %v1168_v3 = vpop.xlane.xlu1 %1167 }
 0x85f   : > { %v1169_v31 = vmul.f32 0.03125, %v1168_v3 }
 0x861   : > { %v1170_v32 = vadd.f32 1e-12, %v1169_v31 }
 0x863   : > { %1702 = vrsqrt.f32 %v1170_v32 }
 0x870   : > { %v1703_v28 = vpop.eup %1702 }
 0x871   : > { %v1172_v33 = vmul.f32 %v1703_v28, %v1164_v27 }
 0x873   : > { %v1177_v34 = vmul.f32 %v2347_v4, %v1172_v33 }
 0x875   : > { %v1182_v35 = vadd.f32 %v2352_v5, %v1177_v34 }
 0x877   : > { %1183 = vst.msk [vmem:[%s426_s4] sm:$0xff] %vm569_vm5, %v1182_v35 }
 0x878   : > { %1879 = shalt.err (!%p1876_p11)
}
 0x879   : > { %s1880_s1 = scalar_lea.hbm %s1198_s17, 128  ;;  %s1884_s4 = scalar_lea.hbm %s2570_s13, 512 }
 0x87a   : > { %p1881_p2 = scmp.ne.s32.totalorder %s1198_s17, %s1880_s1  ;;  %p1885_p5 = scmp.lt.s32.totalorder %s1198_s17, %s2570_s13 }
 0x87b   : > { %p1886_p7 = scmp.lt.s32.totalorder %s1884_s4, %s1880_s1 }
 0x87c   : > { %p1882_p6 = pnand %p1881_p2, %p2571_p4 }
 0x87d   : > { %p1887_p3 = por %p1886_p7, %p1885_p5 }
 0x87e   : > { %p1883_p9 = pneg %p1882_p6 }
 0x880   : > { %p1888_p1 = pnand %p1887_p3, %p1883_p9 }
 0x882   : > { %1891 = shalt.err (!%p1888_p1)
}
 0x883   : > { %1538 = dma.vmem_to_hbm [thread:$0]  (%p2571_p4), %s1201_s15, 128, %s1198_s17, %s1185_s8  }
 0x884 PF: > { %s2572_s0 = sld [smem:[#allocation23_spill]]  ;;  %p1571_p13 = scmp.ge.s32.totalorder %s2002_s11, 2 }
 0x885   : > { %s2573_s12 = sld [smem:[#allocation29_spill]] }
 0x88a   : > { %s1212_s3 = sand.u32 1, %s2572_s0  }
 0x88b   : > { %p2574_p10 = scmp.ne.s32.totalorder %s2573_s12, 0  ;;  %s1213_s19 = scalar_lea.sflag [#allocation7], %s1212_s3 }
 0x88d   : > { %p1561_p0 = pnand %p1571_p13, %p2574_p10 }
 0x88f   : > { %p1562_p8 = pneg %p1561_p0 }
 0x891   : > { %1957 = dma.done.wait (%p1562_p8), %s1213_s19, 128  }
 0x892   : > { %1959 = vsyncadd (%p1562_p8), %s1213_s19, 4294967168  ;;  %s28_s11 = sadd.s32 1, %s2002_s11   ;;  %s2575_s5 = sld [smem:[#allocation26_spill]] }
 0x893   : > { %p25_p12 = scmp.ge.s32.totalorder %s28_s11, 6   ;;  %s2576_s15 = sld [smem:[#allocation28_spill]] }
 0x894   : > { %s2577_s24 = smov %s1966_s25  ;;  %s2578_s25 = smov %s1970_s26 }
 0x895   : > { %s2579_s26 = smov %s2271_s30  ;;  %s2580_s27 = smov %s1978_s28 }
 0x896   : > { %s2581_s28 = smov %s1982_s29  ;;  %s2582_s29 = smov %s2268_s16 }
 0x897   : > { %s2583_s30 = smov %s1994_s9  ;;  %s2584_s8 = smov %s1998_s10 }
 0x898   : > { %s2585_s9 = smov %s2575_s5  ;;  %27 = sbr.rel (!%p25_p12) target bundleno = 21 (0x15), region = 133 }
 0x899   : > { %s2586_s10 = smov %s2576_s15 }
 0x89d   :  { %1218 = vsyncpa [#allocation6], 1 }
 0x89e   :  { %1220 = vsyncpa [#allocation6 + $0x1], 1 }
 0x89f   :  { %1221 = vsyncpa [#allocation9], 1 }
 0x8a0   :  { %1223 = vsyncpa [#allocation9 + $0x1], 1 }
 0x8a1   :  { %1224 = vsyncpa [#allocation12], 1 }
 0x8a2   :  { %1225 = vsyncpa [#allocation15], 1 }
 0x8a3   :  { %1226 = vsyncpa [#allocation7], 1 }
 0x8a4   :  { %1228 = vsyncpa [#allocation7 + $0x1], 1 }

// kernel: tpu_custom_call.1
= control target key start
LH: loop header
LB: loop body
LE: loop exit
PB: predicated region body
PF: predicated region fallthrough
CT: control target
= control target key end

     0   :  { %s2500_s0 = inlined_call_operand.hbm [shape: f32[2,1,16], index: 0, kind: input, shape index: {}]   ;;  %s2501_s1 = inlined_call_operand.hbm [shape: bf16[2,16,32], index: 1, kind: input, shape index: {}]   ;;  %s2502_s2 = inlined_call_operand.hbm [shape: f32[2,16,32], index: 2, kind: input, shape index: {}]   ;;  %s2503_s3 = inlined_call_operand.hbm [shape: bf16[32,32], index: 3, kind: input, shape index: {}]   ;;  %s2504_s4 = inlined_call_operand.hbm [shape: bf16[32,64], index: 4, kind: input, shape index: {}]   ;;  %s2505_s5 = inlined_call_operand.hbm [shape: bf16[32,32], index: 5, kind: input, shape index: {}]   ;;  %s2506_s6 = inlined_call_operand.vmem [shape: f32[6,32], index: 6, kind: input, shape index: {}]   ;;  %s2507_s7 = inlined_call_operand.hbm [shape: f32[2,16,32], index: 7, kind: output, shape index: {}]  }
   0x1   :  { %2525 = sst [smem:[#allocation30_spill]] %s2500_s0 }
   0x2   :  { %2526 = sst [smem:[#allocation31_spill]] %s2501_s1 }
   0x3   :  { %2527 = sst [smem:[#allocation32_spill]] %s2503_s3 }
   0x4   :  { %2528 = sst [smem:[#allocation33_spill]] %s2504_s4 }
   0x5   :  { %2529 = sst [smem:[#allocation34_spill]] %s2505_s5 }
   0x6   :  { %2530 = sst [smem:[#allocation35_spill]] %s2506_s6 }
   0x7   :  { %2531 = sst [smem:[#allocation36_spill]] %s2507_s7 }
   0x8   :  { %12 = vsyncpa [#allocation6], 0 }
   0x9   :  { %14 = vsyncpa [#allocation6 + $0x1], 0 }
   0xa   :  { %15 = vsyncpa [#allocation9], 0 }
   0xb   :  { %17 = vsyncpa [#allocation9 + $0x1], 0 }
   0xc   :  { %18 = vsyncpa [#allocation12], 0 }
   0xd   :  { %19 = vsyncpa [#allocation15], 0 }
   0xe   :  { %20 = vsyncpa [#allocation7], 0 }
   0xf   :  { %22 = vsyncpa [#allocation7 + $0x1], 0  ;;  %s2065_s24 = smov 0   ;;  %s2067_s25 = smov 0  }
  0x10   :  { %s2069_s26 = smov 0   ;;  %s2071_s27 = smov 0  }
  0x11   :  { %s2073_s28 = smov 0   ;;  %s2075_s29 = smov 0  }
  0x12   :  { %s2077_s30 = smov 0   ;;  %s2079_s8 = smov 0  }
  0x13   :  { %s2081_s9 = smov 0   ;;  %s2083_s10 = smov 0  }
  0x14   :  { %s2085_s11 = smov 0  }
  0x15 LB: > { %2532 = sst [smem:[#allocation23_spill]] %s1962_s24  ;;  %s2119_s12 = sadd.s32 4294967295, %s2002_s11   ;;  %s2002_s11 = sphi %s2085_s11, %s28_s11   ;;  %s1998_s10 = sphi %s2083_s10, %s2586_s10   ;;  %s1994_s9 = sphi %s2081_s9, %s2585_s9   ;;  %s1990_s8 = sphi %s2079_s8, %s2584_s8   ;;  %s1986_s30 = sphi %s2077_s30, %s2583_s30   ;;  %s1982_s29 = sphi %s2075_s29, %s2582_s29   ;;  %s1978_s28 = sphi %s2073_s28, %s2581_s28   ;;  %s1974_s27 = sphi %s2071_s27, %s2580_s27   ;;  %s1970_s26 = sphi %s2069_s26, %s2579_s26   ;;  %s1966_s25 = sphi %s2067_s25, %s2578_s25   ;;  %s1962_s24 = sphi %s2065_s24, %s2577_s24  }
  0x16   : > { %2533 = sst [smem:[#allocation24_spill]] %s1986_s30  ;;  %p60_p0 = scmp.ne.s32.totalorder %s1978_s28, %s1974_s27 }
  0x17   : > { %2534 = sst [smem:[#allocation25_spill]] %s1990_s8  ;;  %p2515_p1 = scmp.eq.s32.totalorder %s2119_s12, 0 }
  0x18   : > { %p1356_p3 = scmp.ge.s32.totalorder %s2002_s11, 1  ;;  %p237_p4 = scmp.lt.s32.totalorder %s2002_s11, 5 }
  0x19   : > { %p2128_p5 = por %p2515_p1, %p60_p0  ;;  %s2004_s15 = smov [#allocation11]  }
  0x1a   : > { %p2132_p6 = pnand %p1356_p3, %p237_p4  ;;  %s249_s16 = sshll.u32 %s2004_s15, 4  ;;  %s250_s16 = int_to_ptr.vmem [resolvable:$true] %s249_s16 }
  0x1b   : > { %s1715_s18 = scalar_lea.vmem %s250_s16, 256  ;;  %p1723_p13 = scmp.lt.s32.totalorder %s250_s16, %s250_s16 }
  0x1c   : > { %p1540_p7 = pneg %p2132_p6  ;;  %p1716_p10 = scmp.ne.s32.totalorder %s250_s16, %s1715_s18 }
  0x1d   : > { %p1724_p0 = scmp.lt.s32.totalorder %s1715_s18, %s1715_s18 }
  0x1e   : > { %p2140_p8 = pnand %p1540_p7, %p2515_p1 }
  0x1f   : > { %p1725_p3 = por %p1724_p0, %p1723_p13 }
  0x20   : > { %p1706_p9 = pneg %p2140_p8 }
  0x22   : > { %p1718_p11 = pnand %p1716_p10, %p1706_p9 }
  0x24   : > { %p1719_p12 = pneg %p1718_p11 }
  0x26   : > { %p1726_p4 = pnand %p1725_p3, %p1719_p12 }
  0x28   : > { %1729 = shalt.err (!%p1726_p4)
}
  0x29   : > { %s2509_s19 = smov 64   ;;  %s2511_s20 = smov 4  }
  0x2a   : > { %s2538_s3 = sld [smem:[#allocation32_spill]]  ;;  %p54_p7 = scmp.ne.s32.totalorder %s1982_s29, %s1978_s28 }
  0x2b   : > { %p2516_p10 = scmp.eq.s32.totalorder %s2002_s11, 0  ;;  %p2514_p11 = scmp.lt.s32.totalorder %s2002_s11, 4 }
  0x2c   : > { %s2163_s27 = sand.u32 1, %s1982_s29   ;;  %s309_s15 = sand.u32 1, %s2002_s11  }
  0x2d   : > { %p56_p12 = por %p2516_p10, %p54_p7  ;;  %s1362_s18 = sshll.u32 %s2163_s27, 3 }
  0x2e   : > { %s1415_s7 = sshll.u32 %s1998_s10, 7  ;;  %s2540_s1 = sld [smem:[#allocation31_spill]] }
  0x2f   : > { %p2172_p13 = pnand %p2514_p11, %p56_p12  ;;  %s313_s22 = scalar_lea.vmem [#allocation8], %s1362_s18 }
  0x30   : > { %1543 = dma.hbm_to_vmem [thread:$0]  (!%p2140_p8), %s2538_s3, 256, %s250_s16, [#allocation12], %s2509_s19, %s2509_s19, %s2511_s20  }
  0x31   : > { %s320_s23 = sshll.u32 %s313_s22, 4  ;;  %s2179_s19 = scalar_lea.sflag [#allocation9], %s309_s15  ;;  %s321_s23 = int_to_ptr.vmem [resolvable:$true] %s320_s23 }
  0x32   : > { %p2517_p0 = pneg %p2172_p13  ;;  %s1743_s20 = scalar_lea.vmem %s321_s23, 128 }
  0x33   : > { %p1744_p3 = scmp.ne.s32.totalorder %s321_s23, %s1743_s20  ;;  %s2007_s3 = smov [#allocation8]  }
  0x34   : > { %s319_s16 = scalar_lea.hbm %s2540_s1, %s1415_s7  ;;  %s1748_s6 = sshll.u32 %s2007_s3, 4  ;;  %s1749_s6 = int_to_ptr.vmem [resolvable:$false] %s1748_s6 }
  0x35   : > { %p1746_p4 = pnand %p1744_p3, %p2517_p0  ;;  %s1750_s30 = scalar_lea.vmem %s1749_s6, 256 }
  0x36   : > { %p1751_p12 = scmp.lt.s32.totalorder %s321_s23, %s1749_s6  ;;  %p1752_p11 = scmp.lt.s32.totalorder %s1750_s30, %s1743_s20 }
  0x37   : > { %p1747_p7 = pneg %p1746_p4 }
  0x38   : > { %p1753_p1 = por %p1752_p11, %p1751_p12 }
  0x3a   : > { %p1754_p2 = pnand %p1753_p1, %p1747_p7 }
  0x3c   : > { %1757 = shalt.err (!%p1754_p2)
}
  0x3d   : > { %s2541_s7 = smov 4   ;;  %s2542_s15 = smov 64  }
  0x3e   : > { %1556 = dma.hbm_to_vmem [thread:$0]  (!%p2172_p13), %s319_s16, 128, %s321_s23, %s2179_s19, %s2542_s15, %s2542_s15, %s2541_s7  }
  0x3f   : > { %s2008_s18 = smov [#allocation13]   ;;  %s2009_s22 = smov [#allocation14]  }
  0x40   : > { %s262_s21 = sshll.u32 %s2008_s18, 4  ;;  %s275_s1 = sshll.u32 %s2009_s22, 4  ;;  %s263_s21 = int_to_ptr.vmem [resolvable:$true] %s262_s21  ;;  %s276_s1 = int_to_ptr.vmem [resolvable:$true] %s275_s1 }
  0x41   : > { %s1769_s3 = scalar_lea.vmem %s263_s21, 256  ;;  %p1777_p11 = scmp.lt.s32.totalorder %s263_s21, %s263_s21 }
  0x42   : > { %p1770_p3 = scmp.ne.s32.totalorder %s263_s21, %s1769_s3  ;;  %p1778_p4 = scmp.lt.s32.totalorder %s1769_s3, %s1769_s3 }
  0x44   : > { %p1772_p1 = pnand %p1770_p3, %p1706_p9  ;;  %p1779_p7 = por %p1778_p4, %p1777_p11 }
  0x46   : > { %p1773_p2 = pneg %p1772_p1 }
  0x48   : > { %p1780_p12 = pnand %p1779_p7, %p1773_p2 }
  0x4a   : > { %1783 = shalt.err (!%p1780_p12)
}
  0x4b   : > { %s2543_s4 = sld [smem:[#allocation33_spill]]  ;;  %s1795_s23 = scalar_lea.vmem %s276_s1, 256 }
  0x4c   : > { %p1796_p10 = scmp.ne.s32.totalorder %s276_s1, %s1795_s23  ;;  %p1803_p0 = scmp.lt.s32.totalorder %s276_s1, %s276_s1 }
  0x4d   : > { %p1804_p11 = scmp.lt.s32.totalorder %s1795_s23, %s1795_s23 }
  0x4e   : > { %p1798_p3 = pnand %p1796_p10, %p1706_p9 }
  0x4f   : > { %p1805_p2 = por %p1804_p11, %p1803_p0 }
  0x50   : > { %p1799_p1 = pneg %p1798_p3 }
  0x51   : > { %1546 = dma.hbm_to_vmem [thread:$0]  (!%p2140_p8), %s2543_s4, 256, %s263_s21, [#allocation12], %s2542_s15, %s2542_s15, %s2541_s7  }
  0x52   : > { %p1806_p4 = pnand %p1805_p2, %p1799_p1 }
  0x54   : > { %1809 = shalt.err (!%p1806_p4)
}
  0x55   : > { %s2544_s5 = sld [smem:[#allocation34_spill]]  ;;  %s1361_s18 = sshll.u32 %s1998_s10, 4 }
  0x56   : > { %s295_s21 = scalar_lea.vmem [#allocation5], %s2163_s27  ;;  %s2545_s0 = sld [smem:[#allocation30_spill]] }
  0x57   : > { %s302_s22 = sshll.u32 %s295_s21, 4  ;;  %s293_s17 = scalar_lea.sflag [#allocation6], %s2163_s27  ;;  %s303_s22 = int_to_ptr.vmem [resolvable:$true] %s302_s22 }
  0x58   : > { %s1823_s23 = scalar_lea.vmem %s303_s22, 16  ;;  %p2546_p10 = pneg %p2172_p13 }
  0x59   : > { %p1824_p9 = scmp.ne.s32.totalorder %s303_s22, %s1823_s23  ;;  %s2010_s16 = smov [#allocation5]  }
  0x5a   : > { %s1828_s30 = sshll.u32 %s2010_s16, 4  ;;  %s1829_s30 = int_to_ptr.vmem [resolvable:$false] %s1828_s30 }
  0x5b   : > { %1549 = dma.hbm_to_vmem [thread:$0]  (!%p2140_p8), %s2544_s5, 256, %s276_s1, [#allocation15], %s2542_s15, %s2542_s15, %s2541_s7  }
  0x5c   : > { %s300_s20 = scalar_lea.hbm %s2545_s0, %s1361_s18  ;;  %p1826_p0 = pnand %p1824_p9, %p2546_p10 }
  0x5d   : > { %s1830_s4 = scalar_lea.vmem %s1829_s30, 32  ;;  %p1831_p8 = scmp.lt.s32.totalorder %s303_s22, %s1829_s30 }
  0x5e   : > { %p1827_p7 = pneg %p1826_p0  ;;  %p1832_p12 = scmp.lt.s32.totalorder %s1830_s4, %s1823_s23 }
  0x60   : > { %p1833_p3 = por %p1832_p12, %p1831_p8 }
  0x62   : > { %p1834_p1 = pnand %p1833_p3, %p1827_p7 }
  0x64   : > { %1837 = shalt.err (!%p1834_p1)
}
  0x65   : > { %1553 = dma.hbm_to_vmem [thread:$0]  (!%p2172_p13), %s300_s20, 16, %s303_s22, %s293_s17  }
  0x66   : > { %s1355_s1 = sadd.s32 4294967294, %s2002_s11   ;;  %s37_s4 = sadd.s32 1, %s1994_s9 }
  0x67   : > { %p38_p11 = scmp.ge.s32.totalorder %s37_s4, 2  ;;  %s40_s8 = sadd.s32 1, %s1998_s10 }
  0x68   : > { %s101_s27 = sadd.s32 1, %s1970_s26  ;;  %p108_p2 = scmp.ne.s32.totalorder %s1970_s26, %s1966_s25 }
  0x69   : > { %s2588_s4 = smov (%p38_p11, %s37_s4), 0  ;;  %s2590_s8 = smov (!%p38_p11, %s40_s8), %s1998_s10 }
  0x6a   : > { %2547 = sst [smem:[#allocation26_spill]] %s2588_s4  ;;  %s97_s7 = ssub.s32 %s1994_s9, %s2588_s4 }
  0x6b   : > { %p2548_p4 = scmp.eq.s32.totalorder %s2002_s11, 0  ;;  %p42_p13 = scmp.ge.s32.totalorder %s2590_s8, 2 }
  0x6c   : > { %p114_p10 = scmp.ne.s32.totalorder %s1966_s25, %s1962_s24  ;;  %p2550_p0 = scmp.eq.s32.totalorder %s2119_s12, 3 }
  0x6d   : > { %p2238_p9 = por %p108_p2, %p2548_p4  ;;  %p230_p8 = scmp.eq.s32.totalorder %s1355_s1, 3 }
  0x6e   : > { %p2246_p7 = por %p2550_p0, %p108_p2  ;;  %s2592_s8 = smov (%p42_p13, %s2590_s8), 0 }
  0x6f   : > { %2553 = sst [smem:[#allocation28_spill]] %s2592_s8  ;;  %p2554_p12 = scmp.eq.s32.totalorder %s2119_s12, 0 }
  0x70   : > { %s2551_s18 = scalar_select %p2246_p7, 1, 0 }
  0x71   : > { %p2254_p3 = por %p114_p10, %p2554_p12  ;;  %p2258_p1 = por %p230_p8, %p114_p10 }
  0x72   : > { %2552 = sst [smem:[#allocation27_spill]] %s2551_s18  ;;  %s44_s3 = ssub.s32 %s1998_s10, %s2592_s8 }
  0x73   : > { %s2556_s22 = scalar_select %p2258_p1, 1, 0 }
  0x74   : > { %s332_s6 = sand.u32 1, %s1970_s26   ;;  %p45_p11 = scmp.eq.s32.totalorder %s44_s3, 0 }
  0x75   : > { %2557 = sst [smem:[#allocation29_spill]] %s2556_s22  ;;  %s98_s20 = sor.u32 %s97_s7, %s44_s3 }
  0x76   : > { %p99_p2 = scmp.eq.s32.totalorder %s98_s20, 0  ;;  %s1365_s17 = sshll.u32 %s332_s6, 3 }
  0x77   : > { %s2558_s23 = sadd.s32 1, %s1982_s29  ;;  %s1366_s1 = sshll.u32 %s1998_s10, 1 }
  0x78   : > { %s2268_s16 = scalar_select %p45_p11, %s1982_s29, %s2558_s23  }
  0x79   : > { %s2271_s30 = scalar_select %p99_p2, %s1970_s26, %s101_s27  }
  0x7a   : > { %s339_s0 = sadd.s32 %s1994_s9, %s1366_s1  ;;  %s334_s5 = scalar_lea.vmem [#allocation10], %s1365_s17 }
  0x7b   : > { %s343_s4 = sshll.u32 %s334_s5, 4  ;;  %s1367_s24 = sshll.u32 %s339_s0, 7  ;;  %s344_s4 = int_to_ptr.vmem [resolvable:$true] %s343_s4 }
  0x7c   : > { %s341_s8 = scalar_lea.hbm %s2502_s2, %s1367_s24  ;;  %p2559_p4 = scmp.lt.s32.totalorder %s2002_s11, 4 }
  0x7d   : > { %s1851_s27 = scalar_lea.vmem %s344_s4, 128  ;;  %s2011_s5 = smov [#allocation10]  }
  0x7e   : > { %p2282_p13 = pnand %p2559_p4, %p2238_p9  ;;  %p1852_p0 = scmp.ne.s32.totalorder %s344_s4, %s1851_s27 }
  0x7f   : > { %s1856_s0 = sshll.u32 %s2011_s5, 4  ;;  %s1857_s0 = int_to_ptr.vmem [resolvable:$false] %s1856_s0 }
  0x80   : > { %p1840_p10 = pneg %p2282_p13  ;;  %s1858_s3 = scalar_lea.vmem %s1857_s0, 256 }
  0x81   : > { %p1859_p11 = scmp.lt.s32.totalorder %s344_s4, %s1857_s0  ;;  %p1860_p2 = scmp.lt.s32.totalorder %s1858_s3, %s1851_s27 }
  0x82   : > { %p1854_p8 = pnand %p1852_p0, %p1840_p10 }
  0x83   : > { %p1861_p1 = por %p1860_p2, %p1859_p11 }
  0x84   : > { %p1855_p12 = pneg %p1854_p8 }
  0x86   : > { %p1862_p7 = pnand %p1861_p1, %p1855_p12 }
  0x88   : > { %1865 = shalt.err (!%p1862_p7)
}
  0x89   : > { %1559 = dma.hbm_to_vmem [thread:$0]  (!%p2282_p13), %s341_s8, 128, %s344_s4, %s2179_s19  }
  0x8a   : > { %352 = sbr.rel (%p2132_p6) target bundleno = 2180 (0x884), region = 48  ;;  %s2294_s24 = sand.u32 (!%p2132_p6), 1, %s1978_s28  }
  0x8b   : > { %s355_s15 = scalar_lea.sflag (!%p2132_p6), [#allocation6], %s2294_s24  ;;  %s357_s18 = scalar_lea.vmem (!%p2132_p6), [#allocation5], %s2294_s24 }
  0x8f   : > { %1937 = dma.done.wait (%p2128_p5), %s355_s15, 16  }
  0x90   : > { %1939 = vsyncadd (%p2128_p5), %s355_s15, 4294967280  ;;  %s362_s19 = sand.u32 1, %s2119_s12   ;;  %s1369_s4 = sshll.u32 %s2294_s24, 3 }
  0x91   : > { %s363_s14 = scalar_lea.sflag [#allocation9], %s362_s19  ;;  %s2304_s8 = scalar_lea.vmem [#allocation8], %s1369_s4 }
  0x92   : > { %1941 = dma.done.wait (%p2128_p5), %s363_s14, 128  }
  0x93   : > { %1943 = vsyncadd (%p2128_p5), %s363_s14, 4294967168  ;;  %s373_s22 = sand.u32 1, %s1966_s25  }
  0x94   : > { %s2313_s6 = sshll.u32 %s373_s22, 3 }
  0x95   : > { %s375_s20 = scalar_lea.vmem [#allocation10], %s2313_s6 }
  0x96   : > { %1945 = dma.done.wait (%p2254_p3), %s363_s14, 128  }
  0x97   : > { %1947 = vsyncadd (%p2254_p3), %s363_s14, 4294967168  ;;  %p2561_p6 = scmp.eq.s32.totalorder %s2119_s12, 0 }
  0x99   : > { %1949 = dma.done.wait (%p2561_p6), [#allocation12], 512   ;;  %p2562_p9 = pmov %p2561_p6 }
  0x9a   : > { %p2563_p5 = pmov %p2561_p6 }
  0x9b   : > { %1951 = vsyncadd (%p2562_p9), [#allocation12], 4294966784 }
  0x9c   : > { %1953 = dma.done.wait (%p2563_p5), [#allocation15], 256   ;;  %p2564_p7 = pmov %p2563_p5 }
  0x9d   : > { %s2565_s23 = sld [smem:[#allocation35_spill]]  ;;  %s426_s4 = scalar_lea.vmem [#allocation16], %s2313_s6 }
  0x9e   : > { %1955 = vsyncadd (%p2564_p7), [#allocation15], 4294967040  ;;  %s2566_s14 = sld [smem:[#allocation24_spill]] }
  0xa3   : > { %v2331_v0 = vld [vmem:[%s2565_s23] ss:$0 sm:$0xff]  ;;  %v1380_v1 = vld [vmem:[%s2565_s23 + $0x1] ss:$0 sm:$0xff]  ;;  %v1383_v2 = vld [vmem:[%s2565_s23 + $0x2] ss:$0 sm:$0xff] }
  0xa4   : > { %v2342_v3 = vld [vmem:[%s2565_s23 + $0x3] ss:$0 sm:$0xff]  ;;  %v2347_v4 = vld [vmem:[%s2565_s23 + $0x4] ss:$0 sm:$0xff]  ;;  %v2352_v5 = vld [vmem:[%s2565_s23 + $0x5] ss:$0 sm:$0xff] }
  0xa5   : > { %p1375_p3 = scmp.ne.s32.totalorder %s2566_s14, 0 }
  0xa6   : > { %s2014_s13 = smov (!%p1375_p3), 32   ;;  %s2015_s17 = smov (!%p1375_p3), 96  }
  0xa7   : > { %437 = sbr.rel (%p1375_p3) target bundleno = 498 (0x1f2), region = 76 }
  0xac   : > { %v1677_v6 = vld [vmem:[#allocation13 + $0x8] sm:$0xff]   ;;  %v2012_v7 = vmov 0.0   ;;  %v1678_v8 = vld [vmem:[#allocation13] sm:$0xff]   ;;  %vm2013_vm0 = vmmov 0   ;;  %528 = vrot.lane.b32.xlu0 %v1383_v2, %s2014_s13  ;;  %v1679_v9 = vld [vmem:[%s2304_s8] sm:$0xff]   ;;  %vm461_vm1 = vcmask 261120  }
  0xad   : > { %1448 = vmatprep.subr.bf16.mxu0 %v2012_v7  ;;  %1452 = vmatprep.mubr.msk.bf16.mxu0 %vm2013_vm0, %v2012_v7  ;;  %vm520_vm2 = vcmask 257024  }
  0xae   : > { %1449 = vmatpush3.bf16.msra.mxu0 %v1677_v6 }
  0xaf   : > { %1450 = vmatprep.subr.bf16.mxu0 %v2012_v7 }
  0xb2   : > { %1451 = vmatpush3.bf16.msra.mxu0 %v1678_v8 }
  0xb5   : > { %1453 = vmatmul.mubr.msk.bf16.vlgmr.msra.gmra.mxu0 %vm461_vm1, %v1679_v9 }
 0x11e   : > { %v529_v10 = vpop.permute.xlu0 %528 }
 0x175   : > { %v499_v11 = vpop.f32.mrf.mxu0 }
 0x176   : > { %v510_v12 = vadd.f32 %v1380_v1, %v499_v11  ;;  %v531_v13 = vadd.f32 %v529_v10, %v499_v11 }
 0x177   : > { %v1454_v14 = vpop.f32.mrf.mxu0 }
 0x178   : > { %v1416_v15 = vpack.c.bf16 %v510_v12, %v510_v12  ;;  %v1418_v16 = vpack.c.bf16 %v531_v13, %v531_v13 }
 0x179   : > { %v502_v17 = vpop.f32.mrf.mxu0 }
 0x17a   : > { %521 = vst.msk [vmem:[#allocation2] sm:$0xf] %vm520_vm2, %v1416_v15  ;;  %v511_v18 = vadd.f32 %v1380_v1, %v502_v17  ;;  %v532_v19 = vadd.f32 %v529_v10, %v502_v17  ;;  %539 = vrot.lane.b32.xlu0 %v1418_v16, %s2015_s17 }
 0x17b   : > { %v1455_v20 = vpop.f32.mrf.mxu0 }
 0x17c   : > { %v1417_v21 = vpack.c.bf16 %v511_v18, %v511_v18  ;;  %v1419_v22 = vpack.c.bf16 %v532_v19, %v532_v19 }
 0x17e   : > { %522 = vst.msk [vmem:[#allocation2 + $0x4] sm:$0xf] %vm520_vm2, %v1417_v21  ;;  %541 = vrot.lane.b32.xlu1 %v1419_v22, %s2015_s17 }
 0x1ec   : > { %v540_v23 = vpop.permute.xlu0 %539 }
 0x1ed   : > { %545 = vst.msk [vmem:[#allocation3] sm:$0xf] %vm520_vm2, %v540_v23 }
 0x1f0   : > { %v542_v24 = vpop.permute.xlu1 %541 }
 0x1f1   : > { %546 = vst.msk [vmem:[#allocation3 + $0x4] sm:$0xf] %vm520_vm2, %v542_v24 }
 0x1f2 PF: > { %v1680_v25 = vld [vmem:[#allocation11 + $0x8] sm:$0xff]   ;;  %v2016_v26 = vmov 0.0   ;;  %v1681_v27 = vld [vmem:[#allocation11] sm:$0xff]   ;;  %vm2017_vm3 = vmmov 0   ;;  %v2367_v28 = vld [vmem:[%s375_s20] sm:$0xff]  ;;  %vm630_vm4 = vcmask 64512  }
 0x1f3   : > { %1456 = vmatprep.subr.bf16.mxu0 %v2016_v26  ;;  %1464 = vmatprep.subr.bf16.mxu1 %v2016_v26  ;;  %v1682_v29 = vld [vmem:[#allocation2] sm:$0xff]   ;;  %v548_v30 = vpack.c.bf16 %v2367_v28, %v2367_v28  ;;  %s2018_s8 = smov 120   ;;  %vm569_vm5 = vcmask 261120   ;;  %s2019_s20 = smov 112   ;;  %v1390_v47 = vld [vmem:[%s357_s18] ss:$0 sm:$0xff] }
 0x1f4   : > { %1457 = vmatpush3.bf16.msra.mxu0 %v1680_v25  ;;  %1460 = vmatprep.mubr.msk.bf16.mxu0 %vm2017_vm3, %v2016_v26  ;;  %v635_v31 = vsel %vm630_vm4, %v1682_v29, 0  ;;  %s2020_s21 = smov 104   ;;  %vm677_vm6 = vcmask 130048   ;;  %vm740_vm7 = vcmask 60416   ;;  %s2021_s24 = smov 8   ;;  %vm858_vm8 = vcmask 126016  }
 0x1f5   : > { %1458 = vmatprep.subr.bf16.mxu0 %v2016_v26  ;;  %1466 = vmatprep.mubr.msk.bf16.mxu1 %vm2017_vm3, %v2016_v26  ;;  %s2022_s18 = smov 16   ;;  %s2023_s1 = smov 24   ;;  %vm975_vm9 = vcmask 191616   ;;  %vm1092_vm10 = vcmask 257216  }
 0x1f6   : > { %745 = vrot.lane.b32.xlu0 %v1682_v29, %s2018_s8  ;;  %1465 = vmatpush3.bf16.xpose.msra.mxu1 %v635_v31  ;;  %s2567_s7 = sld [smem:[#allocation25_spill]]  ;;  %s1200_s15 = sshll.u32 %s426_s4, 4  ;;  %s1201_s15 = int_to_ptr.vmem [resolvable:$true] %s1200_s15 }
 0x1f7   : > { %1476 = vmatprep.subr.bf16.mxu1 %v2016_v26  ;;  %862 = vrot.lane.b32.xlu1 %v1682_v29, %s2019_s20  ;;  %s2568_s27 = sld [smem:[#allocation24_spill]] }
 0x1f8   : > { %1459 = vmatpush3.bf16.msra.mxu0 %v1681_v27  ;;  %v1683_v54 = vld [vmem:[#allocation3] sm:$0xff]   ;;  %s2569_s5 = sld [smem:[#allocation27_spill]] }
 0x1f9   : > { %1470 = vmatprep.subr.bf16.mxu0 %v2016_v26  ;;  %s2570_s13 = sld [smem:[#allocation36_spill]] }
 0x1fb   : > { %1461 = vmatmul.mubr.msk.bf16.vlgmr.msra.gmra.mxu0 %vm569_vm5, %v548_v30 }
 0x1fc   : > { %1472 = vmatprep.mubr.msk.bf16.mxu0 %vm2017_vm3, %v2016_v26  ;;  %1471 = vmatpush3.bf16.msra.mxu0 %v1683_v54  ;;  %s1411_s0 = sshll.u32 %s2567_s7, 1 }
 0x1fd   : > { %1482 = vmatprep.subr.bf16.mxu0 %v2016_v26  ;;  %s1196_s12 = sadd.s32 %s2568_s27, %s1411_s0 }
 0x1fe   : > { %s1412_s3 = sshll.u32 %s1196_s12, 7  ;;  %p2571_p4 = scmp.ne.s32.totalorder %s2569_s5, 0 }
 0x1ff   : > { %s1198_s17 = scalar_lea.hbm %s2570_s13, %s1412_s3 }
 0x268   : > { %v746_v34 = vpop.permute.xlu0 %745 }
 0x269   : > { %v751_v38 = vsel %vm630_vm4, %v746_v34, 0  ;;  %v863_v40 = vpop.permute.xlu1 %862 }
 0x26a   : > { %v868_v41 = vsel %vm630_vm4, %v863_v40, 0 }
 0x2bb   : > { %v607_v32 = vpop.f32.mrf.mxu0 }
 0x2bc   : > { %v608_v33 = vadd.f32 %v2331_v0, %v607_v32 }
 0x2bd   : > { %v1462_v35 = vpop.f32.mrf.mxu0 }
 0x2be   : > { %v613_v36 = vpack.c.bf16 %v608_v33, %v608_v33 }
 0x2bf   : > { %v610_v37 = vpop.f32.mrf.mxu0 }
 0x2c0   : > { %860 = vrot.lane.b32.xlu1 %v613_v36, %s2019_s20  ;;  %743 = vrot.lane.b32.xlu0 %v613_v36, %s2018_s8 }
 0x2c1   : > { %1467 = vmatmul.mubr.msk.bf16.vlgmr.msra.gmra.mxu1 %vm630_vm4, %v613_v36  ;;  %v1463_v39 = vpop.f32.mrf.mxu0 }
 0x2c2   : > { %1477 = vmatpush3.bf16.xpose.msra.mxu1 %v751_v38  ;;  %1478 = vmatprep.mubr.msk.bf16.mxu1 %vm2017_vm3, %v2016_v26 }
 0x2c3   : > { %1488 = vmatprep.subr.bf16.mxu1 %v2016_v26 }
 0x2c4   : > { %977 = vrot.lane.b32.xlu1 %v613_v36, %s2020_s21  ;;  %979 = vrot.lane.b32.xlu0 %v1682_v29, %s2020_s21 }
 0x332   : > { %v744_v42 = vpop.permute.xlu0 %743  ;;  %v861_v45 = vpop.permute.xlu1 %860 }
 0x333   : > { %1479 = vmatmul.mubr.msk.bf16.vlgmr.msra.gmra.mxu1 %vm630_vm4, %v744_v42 }
 0x334   : > { %1489 = vmatpush3.bf16.xpose.msra.mxu1 %v868_v41  ;;  %1490 = vmatprep.mubr.msk.bf16.mxu1 %vm2017_vm3, %v2016_v26 }
 0x335   : > { %1500 = vmatprep.subr.bf16.mxu1 %v2016_v26 }
 0x336   : > { %v980_v43 = vpop.permute.xlu0 %979  ;;  %v978_v46 = vpop.permute.xlu1 %977 }
 0x337   : > { %v985_v44 = vsel %vm630_vm4, %v980_v43, 0 }
 0x33b   : > { %1491 = vmatmul.mubr.msk.bf16.vlgmr.msra.gmra.mxu1 %vm630_vm4, %v861_v45 }
 0x33c   : > { %1501 = vmatpush3.bf16.xpose.msra.mxu1 %v985_v44  ;;  %1502 = vmatprep.mubr.msk.bf16.mxu1 %vm2017_vm3, %v2016_v26 }
 0x33d   : > { %1512 = vmatprep.subr.bf16.mxu1 %v2016_v26 }
 0x343   : > { %1503 = vmatmul.mubr.msk.bf16.vlgmr.msra.gmra.mxu1 %vm630_vm4, %v978_v46 }
 0x344   : > { %1516 = vmatprep.mubr.msk.bf16.mxu1 %vm2017_vm3, %v2016_v26 }
 0x381   : > { %v671_v48 = vpop.f32.mrf.mxu1 }
 0x382   : > { %v672_v49 = vadd.f32 %v1390_v47, %v671_v48 }
 0x383   : > { %v1468_v50 = vpop.f32.mrf.mxu1 }
 0x384   : > { %v678_v51 = vsel %vm677_vm6, %v672_v49, -inf }
 0x385   : > { %679 = vmax.xlane.f32.xlu0 %v678_v51  ;;  %v674_v52 = vpop.f32.mrf.mxu1 }
 0x387   : > { %v1469_v53 = vpop.f32.mrf.mxu1 }
 0x3f3   : > { %v787_v55 = vpop.f32.mrf.mxu1 }
 0x3f4   : > { %v788_v56 = vadd.f32 %v1390_v47, %v787_v55 }
 0x3f5   : > { %v1480_v57 = vpop.f32.mrf.mxu1 }
 0x3f6   : > { %v793_v58 = vsel %vm677_vm6, %v788_v56, -inf }
 0x3f7   : > { %794 = vmax.xlane.f32.xlu1 %v793_v58  ;;  %v790_v59 = vpop.f32.mrf.mxu1 }
 0x3f9   : > { %v1481_v60 = vpop.f32.mrf.mxu1 }
 0x3fb   : > { %v904_v61 = vpop.f32.mrf.mxu1 }
 0x3fc   : > { %v905_v62 = vadd.f32 %v1390_v47, %v904_v61 }
 0x3fd   : > { %v1492_v63 = vpop.f32.mrf.mxu1 }
 0x3fe   : > { %v910_v0 = vsel %vm677_vm6, %v905_v62, -inf  ;;  %v1684_v63 = vld [vmem:[#allocation14 + $0x8] sm:$0xff]  }
 0x3ff   : > { %911 = vmax.xlane.f32.xlu0 %v910_v0  ;;  %v907_v1 = vpop.f32.mrf.mxu1  ;;  %1513 = vmatpush3.bf16.msra.mxu1 %v1684_v63 }
 0x400   : > { %v1685_v1 = vld [vmem:[#allocation14] sm:$0xff]   ;;  %1514 = vmatprep.subr.bf16.mxu1 %v2016_v26 }
 0x401   : > { %v1493_v2 = vpop.f32.mrf.mxu1 }
 0x403   : > { %v1021_v6 = vpop.f32.mrf.mxu1  ;;  %1515 = vmatpush3.bf16.msra.mxu1 %v1685_v1 }
 0x404   : > { %v1022_v7 = vadd.f32 %v1390_v47, %v1021_v6 }
 0x405   : > { %v1504_v8 = vpop.f32.mrf.mxu1 }
 0x406   : > { %v1027_v9 = vsel %vm677_vm6, %v1022_v7, -inf }
 0x407   : > { %1028 = vmax.xlane.f32.xlu0 %v1027_v9  ;;  %v1024_v10 = vpop.f32.mrf.mxu1 }
 0x409   : > { %v1505_v11 = vpop.f32.mrf.mxu1 }
 0x40e   : > { %v680_v12 = vpop.xlane.xlu0 %679 }
 0x40f   : > { %v681_v13 = vsub.f32 %v672_v49, %v680_v12 }
 0x411   : > { %v682_v14 = vmul.f32 1.442695, %v681_v13 }
 0x413   : > { %1686 = vpow2.f32 %v682_v14 }
 0x420   : > { %v1687_v15 = vpop.eup %1686 }
 0x421   : > { %v684_v16 = vsel %vm677_vm6, %v1687_v15, 0.0 }
 0x422   : > { %685 = vadd.xlane.f32.xlu1 %v684_v16 }
 0x433   : > { %805 = vrot.lane.b32.xlu1 %v1683_v54, %s2018_s8  ;;  %s1185_s8 = scalar_lea.sflag [#allocation7], %s373_s22 }
 0x480   : > { %v795_v17 = vpop.xlane.xlu1 %794 }
 0x481   : > { %v796_v18 = vsub.f32 %v788_v56, %v795_v17 }
 0x483   : > { %v797_v19 = vmul.f32 1.442695, %v796_v18 }
 0x485   : > { %1688 = vpow2.f32 %v797_v19 }
 0x488   : > { %v912_v20 = vpop.xlane.xlu0 %911 }
 0x489   : > { %v913_v21 = vsub.f32 %v905_v62, %v912_v20 }
 0x48b   : > { %v914_v22 = vmul.f32 1.442695, %v913_v21 }
 0x48d   : > { %1690 = vpow2.f32 %v914_v22 }
 0x490   : > { %v1029_v23 = vpop.xlane.xlu0 %1028 }
 0x491   : > { %v1030_v24 = vsub.f32 %v1022_v7, %v1029_v23 }
 0x492   : > { %v1689_v25 = vpop.eup %1688 }
 0x493   : > { %v1031_v27 = vmul.f32 1.442695, %v1030_v24  ;;  %v799_v29 = vsel %vm677_vm6, %v1689_v25, 0.0 }
 0x494   : > { %800 = vadd.xlane.f32.xlu0 %v799_v29 }
 0x495   : > { %1692 = vpow2.f32 %v1031_v27 }
 0x49a   : > { %v1691_v30 = vpop.eup %1690 }
 0x49b   : > { %v916_v31 = vsel %vm677_vm6, %v1691_v30, 0.0 }
 0x49c   : > { %917 = vadd.xlane.f32.xlu1 %v916_v31 }
 0x4a2   : > { %v1693_v32 = vpop.eup %1692 }
 0x4a3   : > { %v1033_v33 = vsel %vm677_vm6, %v1693_v32, 0.0 }
 0x4a4   : > { %1034 = vadd.xlane.f32.xlu0 %v1033_v33 }
 0x4ab   : > { %v686_v34 = vpop.xlane.xlu1 %685 }
 0x4ac   : > { %1694 = vrcp.f32 %v686_v34 }
 0x4ad   : > { %1039 = vrot.lane.b32.xlu1 %v1683_v54, %s2020_s21  ;;  %s2024_s21 = smov [#allocation16]  }
 0x4af   : > { %v806_v38 = vpop.permute.xlu1 %805 }
 0x4b9   : > { %v1695_v35 = vpop.eup %1694 }
 0x4ba   : > { %v688_v36 = vmul.f32 %v1695_v35, %v1687_v15  ;;  %922 = vrot.lane.b32.xlu0 %v1683_v54, %s2019_s20  ;;  %s1866_s20 = scalar_lea.vmem %s1201_s15, 128 }
 0x4bb   : > { %p1867_p1 = scmp.ne.s32.totalorder %s1201_s15, %s1866_s20 }
 0x4bc   : > { %v689_v37 = vpack.c.bf16 %v688_v36, %v688_v36 }
 0x4bd   : > { %p1868_p13 = pnand %p1867_p1, %p2571_p4 }
 0x4be   : > { %1473 = vmatmul.mubr.msk.bf16.vlgmr.msra.gmra.mxu0 %vm677_vm6, %v689_v37 }
 0x4bf   : > { %1483 = vmatpush3.bf16.msra.mxu0 %v806_v38  ;;  %1484 = vmatprep.mubr.msk.bf16.mxu0 %vm2017_vm3, %v2016_v26  ;;  %p1869_p10 = pneg %p1868_p13 }
 0x4c0   : > { %1494 = vmatprep.subr.bf16.mxu0 %v2016_v26 }
 0x51d   : > { %v801_v39 = vpop.xlane.xlu0 %800 }
 0x51e   : > { %1696 = vrcp.f32 %v801_v39 }
 0x525   : > { %v918_v40 = vpop.xlane.xlu1 %917 }
 0x526   : > { %1698 = vrcp.f32 %v918_v40 }
 0x529   : > { %v1040_v49 = vpop.permute.xlu1 %1039 }
 0x52b   : > { %v1697_v41 = vpop.eup %1696 }
 0x52c   : > { %v803_v42 = vmul.f32 %v1697_v41, %v1689_v25 }
 0x52d   : > { %v1035_v43 = vpop.xlane.xlu0 %1034 }
 0x52e   : > { %1700 = vrcp.f32 %v1035_v43  ;;  %v804_v44 = vpack.c.bf16 %v803_v42, %v803_v42 }
 0x530   : > { %1485 = vmatmul.mubr.msk.bf16.vlgmr.msra.gmra.mxu0 %vm677_vm6, %v804_v44 }
 0x531   : > { %v923_v45 = vpop.permute.xlu0 %922  ;;  %1496 = vmatprep.mubr.msk.bf16.mxu0 %vm2017_vm3, %v2016_v26 }
 0x532   : > { %1495 = vmatpush3.bf16.msra.mxu0 %v923_v45 }
 0x533   : > { %v1699_v46 = vpop.eup %1698  ;;  %1506 = vmatprep.subr.bf16.mxu0 %v2016_v26 }
 0x534   : > { %v920_v47 = vmul.f32 %v1699_v46, %v1691_v30 }
 0x536   : > { %v921_v48 = vpack.c.bf16 %v920_v47, %v920_v47 }
 0x538   : > { %1497 = vmatmul.mubr.msk.bf16.vlgmr.msra.gmra.mxu0 %vm677_vm6, %v921_v48 }
 0x539   : > { %1507 = vmatpush3.bf16.msra.mxu0 %v1040_v49  ;;  %1508 = vmatprep.mubr.msk.bf16.mxu0 %vm2017_vm3, %v2016_v26 }
 0x53b   : > { %v1701_v50 = vpop.eup %1700 }
 0x53c   : > { %v1037_v51 = vmul.f32 %v1701_v50, %v1693_v32 }
 0x53e   : > { %v1038_v52 = vpack.c.bf16 %v1037_v51, %v1037_v51 }
 0x540   : > { %1509 = vmatmul.mubr.msk.bf16.vlgmr.msra.gmra.mxu0 %vm677_vm6, %v1038_v52 }
 0x57e   : > { %v733_v53 = vpop.f32.mrf.mxu0 }
 0x57f   : > { %v739_v54 = vpack.c.bf16 %v733_v53, %v733_v53 }
 0x580   : > { %v1474_v55 = vpop.f32.mrf.mxu0 }
 0x581   : > { %741 = vst.msk [vmem:[#allocation4] sm:$0xf] %vm740_vm7, %v739_v54 }
 0x582   : > { %v736_v56 = vpop.f32.mrf.mxu0 }
 0x584   : > { %v1475_v57 = vpop.f32.mrf.mxu0 }
 0x5f0   : > { %v845_v58 = vpop.f32.mrf.mxu0 }
 0x5f1   : > { %v1420_v59 = vpack.c.bf16 %v845_v58, %v845_v58 }
 0x5f2   : > { %v1486_v60 = vpop.f32.mrf.mxu0 }
 0x5f3   : > { %855 = vrot.lane.b32.xlu1 %v1420_v59, %s2021_s24  ;;  %s1870_s24 = sshll.u32 %s2024_s21, 4  ;;  %s1871_s24 = int_to_ptr.vmem [resolvable:$false] %s1870_s24 }
 0x5f4   : > { %v848_v61 = vpop.f32.mrf.mxu0  ;;  %p1873_p0 = scmp.lt.s32.totalorder %s1201_s15, %s1871_s24 }
 0x5f6   : > { %v1487_v62 = vpop.f32.mrf.mxu0 }
 0x5f8   : > { %v962_v0 = vpop.f32.mrf.mxu0 }
 0x5f9   : > { %v1421_v2 = vpack.c.bf16 %v962_v0, %v962_v0 }
 0x5fa   : > { %v1498_v6 = vpop.f32.mrf.mxu0 }
 0x5fb   : > { %972 = vrot.lane.b32.xlu0 %v1421_v2, %s2022_s18  ;;  %s1872_s18 = scalar_lea.vmem %s1871_s24, 256 }
 0x5fc   : > { %v965_v7 = vpop.f32.mrf.mxu0  ;;  %p1874_p8 = scmp.lt.s32.totalorder %s1872_s18, %s1866_s20 }
 0x5fe   : > { %v1499_v8 = vpop.f32.mrf.mxu0  ;;  %p1875_p12 = por %p1874_p8, %p1873_p0 }
 0x600   : > { %v1079_v9 = vpop.f32.mrf.mxu0  ;;  %p1876_p11 = pnand %p1875_p12, %p1869_p10 }
 0x601   : > { %v1422_v10 = vpack.c.bf16 %v1079_v9, %v1079_v9 }
 0x602   : > { %v1510_v11 = vpop.f32.mrf.mxu0 }
 0x603   : > { %1089 = vrot.lane.b32.xlu1 %v1422_v10, %s2023_s1 }
 0x604   : > { %v1082_v12 = vpop.f32.mrf.mxu0 }
 0x606   : > { %v1511_v13 = vpop.f32.mrf.mxu0 }
 0x665   : > { %v856_v14 = vpop.permute.xlu1 %855 }
 0x666   : > { %859 = vst.msk [vmem:[#allocation4] sm:$0xf] %vm858_vm8, %v856_v14 }
 0x66d   : > { %v973_v15 = vpop.permute.xlu0 %972 }
 0x66e   : > { %976 = vst.msk [vmem:[#allocation4] sm:$0xf] %vm975_vm9, %v973_v15 }
 0x675   : > { %v1090_v26 = vpop.permute.xlu1 %1089 }
 0x676   : > { %1093 = vst.msk [vmem:[#allocation4] sm:$0xf] %vm1092_vm10, %v1090_v26 }
 0x67d   : > { %v1094_v16 = vld [vmem:[#allocation4] sm:$0xf] }
 0x67e   : > { %1517 = vmatmul.mubr.msk.bf16.vlgmr.msra.gmra.mxu1 %vm569_vm5, %v1094_v16 }
 0x73e   : > { %v1152_v17 = vpop.f32.mrf.mxu1 }
 0x73f   : > { %v1153_v18 = vadd.f32 %v2342_v3, %v1152_v17 }
 0x740   : > { %v1518_v19 = vpop.f32.mrf.mxu1 }
 0x741   : > { %v1158_v20 = vadd.f32 %v1153_v18, %v2367_v28 }
 0x742   : > { %v1155_v21 = vpop.f32.mrf.mxu1 }
 0x743   : > { %v1159_v22 = vsel %vm569_vm5, %v1158_v20, 0.0 }
 0x744   : > { %1160 = vadd.xlane.f32.xlu0 %v1159_v22  ;;  %v1519_v23 = vpop.f32.mrf.mxu1 }
 0x7cd   : > { %v1161_v24 = vpop.xlane.xlu0 %1160 }
 0x7ce   : > { %v1163_v25 = vmul.f32 0.03125, %v1161_v24 }
 0x7d0   : > { %v1164_v27 = vsub.f32 %v1158_v20, %v1163_v25 }
 0x7d2   : > { %v1165_v29 = vmul.f32 %v1164_v27, %v1164_v27 }
 0x7d4   : > { %v1166_v30 = vsel %vm569_vm5, %v1165_v29, 0.0 }
 0x7d5   : > { %1167 = vadd.xlane.f32.xlu1 %v1166_v30 }
 0x85e   : > { %v1168_v3 = vpop.xlane.xlu1 %1167 }
 0x85f   : > { %v1169_v31 = vmul.f32 0.03125, %v1168_v3 }
 0x861   : > { %v1170_v32 = vadd.f32 1e-12, %v1169_v31 }
 0x863   : > { %1702 = vrsqrt.f32 %v1170_v32 }
 0x870   : > { %v1703_v28 = vpop.eup %1702 }
 0x871   : > { %v1172_v33 = vmul.f32 %v1703_v28, %v1164_v27 }
 0x873   : > { %v1177_v34 = vmul.f32 %v2347_v4, %v1172_v33 }
 0x875   : > { %v1182_v35 = vadd.f32 %v2352_v5, %v1177_v34 }
 0x877   : > { %1183 = vst.msk [vmem:[%s426_s4] sm:$0xff] %vm569_vm5, %v1182_v35 }
 0x878   : > { %1879 = shalt.err (!%p1876_p11)
}
 0x879   : > { %s1880_s1 = scalar_lea.hbm %s1198_s17, 128  ;;  %s1884_s4 = scalar_lea.hbm %s2570_s13, 512 }
 0x87a   : > { %p1881_p2 = scmp.ne.s32.totalorder %s1198_s17, %s1880_s1  ;;  %p1885_p5 = scmp.lt.s32.totalorder %s1198_s17, %s2570_s13 }
 0x87b   : > { %p1886_p7 = scmp.lt.s32.totalorder %s1884_s4, %s1880_s1 }
 0x87c   : > { %p1882_p6 = pnand %p1881_p2, %p2571_p4 }
 0x87d   : > { %p1887_p3 = por %p1886_p7, %p1885_p5 }
 0x87e   : > { %p1883_p9 = pneg %p1882_p6 }
 0x880   : > { %p1888_p1 = pnand %p1887_p3, %p1883_p9 }
 0x882   : > { %1891 = shalt.err (!%p1888_p1)
}
 0x883   : > { %1538 = dma.vmem_to_hbm [thread:$0]  (%p2571_p4), %s1201_s15, 128, %s1198_s17, %s1185_s8  }
 0x884 PF: > { %s2572_s0 = sld [smem:[#allocation23_spill]]  ;;  %p1571_p13 = scmp.ge.s32.totalorder %s2002_s11, 2 }
 0x885   : > { %s2573_s12 = sld [smem:[#allocation29_spill]] }
 0x88a   : > { %s1212_s3 = sand.u32 1, %s2572_s0  }
 0x88b   : > { %p2574_p10 = scmp.ne.s32.totalorder %s2573_s12, 0  ;;  %s1213_s19 = scalar_lea.sflag [#allocation7], %s1212_s3 }
 0x88d   : > { %p1561_p0 = pnand %p1571_p13, %p2574_p10 }
 0x88f   : > { %p1562_p8 = pneg %p1561_p0 }
 0x891   : > { %1957 = dma.done.wait (%p1562_p8), %s1213_s19, 128  }
 0x892   : > { %1959 = vsyncadd (%p1562_p8), %s1213_s19, 4294967168  ;;  %s28_s11 = sadd.s32 1, %s2002_s11   ;;  %s2575_s5 = sld [smem:[#allocation26_spill]] }
 0x893   : > { %p25_p12 = scmp.ge.s32.totalorder %s28_s11, 6   ;;  %s2576_s15 = sld [smem:[#allocation28_spill]] }
 0x894   : > { %s2577_s24 = smov %s1966_s25  ;;  %s2578_s25 = smov %s1970_s26 }
 0x895   : > { %s2579_s26 = smov %s2271_s30  ;;  %s2580_s27 = smov %s1978_s28 }
 0x896   : > { %s2581_s28 = smov %s1982_s29  ;;  %s2582_s29 = smov %s2268_s16 }
 0x897   : > { %s2583_s30 = smov %s1994_s9  ;;  %s2584_s8 = smov %s1998_s10 }
 0x898   : > { %s2585_s9 = smov %s2575_s5  ;;  %27 = sbr.rel (!%p25_p12) target bundleno = 21 (0x15), region = 133 }
 0x899   : > { %s2586_s10 = smov %s2576_s15 }
 0x89d   :  { %1218 = vsyncpa [#allocation6], 1 }
 0x89e   :  { %1220 = vsyncpa [#allocation6 + $0x1], 1 }
 0x89f   :  { %1221 = vsyncpa [#allocation9], 1 }
 0x8a0   :  { %1223 = vsyncpa [#allocation9 + $0x1], 1 }
 0x8a1   :  { %1224 = vsyncpa [#allocation12], 1 }
 0x8a2   :  { %1225 = vsyncpa [#allocation15], 1 }
 0x8a3   :  { %1226 = vsyncpa [#allocation7], 1 }
 0x8a4   :  { %1228 = vsyncpa [#allocation7 + $0x1], 1 }

</bundles_post_ra>
